<compile_context>
chip_gen: v5e
topology: v5e:2x2
jax: 0.10.0
libtpu: 0.0.40
codegen_flags: <defaults>
</compile_context>

<pallas_src>
import math

import jax
import jax.numpy as jnp
from jax.experimental import pallas as pl
from jax.experimental.pallas import tpu as pltpu

EMBED = 32
HEADS = 4
LN_EPS = 1e-5


# ----------------------------- kernel helpers -----------------------------

def _layer_norm(x, w, b):
    mu = jnp.mean(x, axis=-1, keepdims=True)
    xc = x - mu
    var = jnp.mean(xc * xc, axis=-1, keepdims=True)
    inv = jax.lax.rsqrt(var + LN_EPS)
    return xc * inv * w + b


def _gelu(x):
    # exact (erf-based) GELU, matching torch.nn.GELU() default
    return 0.5 * x * (1.0 + jax.lax.erf(x * (1.0 / math.sqrt(2.0))))


def _row_group(rows, embed):
    """How many E-wide rows get packed into one 128-lane output row (1 = none)."""
    if 128 % embed == 0:
        g = 128 // embed
        if rows % g == 0:
            return g
    return 1


def _lane_pack(x, group):
    """In-kernel: (R, E) value -> (R//group, group*E) lane-dense value.
    dense[r, j*E:(j+1)*E] = x[j*(R//group) + r]  (contiguous sublane slices)."""
    if group == 1:
        return x
    rd = x.shape[0] // group
    return jnp.concatenate([x[j * rd:(j + 1) * rd, :] for j in range(group)],
                           axis=-1)


def _host_unpack(y, group, embed):
    """Wrapper-side inverse of _lane_pack: (Rd, group*E) -> (Rd*group, E)."""
    if group == 1:
        return y
    rd = y.shape[0]
    return y.reshape(rd, group, embed).transpose(1, 0, 2).reshape(rd * group, embed)


# --------------------------------- kernel ---------------------------------

def _make_kernel(B, Lq, Lk, E, H, gq, gk):
    hd = E // H

    def kernel(
        xq_ref,         # (B*Lq, E) f32
        xk_ref,         # (B*Lk, E) f32
        xv_ref,         # (B*Lk, E) f32
        w_qkv_ref,      # (3, E, E)      bf16  Wq(pre-scaled) | Wk | Wv
        b_qkv_ref,      # (3, 1, E)      f32   bq(pre-scaled) | bk | bv
        w_o_ref,        # (E, E)         bf16  Wo
        w_ffn_in_ref,   # (2, E, HID)    bf16  fc1.w | fc3.w
        b_ffn_in_ref,   # (2, 1, HID)    f32   fc1.b | fc3.b
        w_ffn_out_ref,  # (2, HID, E)    bf16  fc2.w | fc4.w
        vec_ref,        # (8, 1, E)      f32   ln0w, ln0b, ln1w, ln1b, bo, fc2b, fc4b, pad
        outq_ref,       # (B*Lq//gq, gq*E) f32 lane-dense
        outk_ref,       # (B*Lk//gk, gk*E) f32 lane-dense
    ):
        xq = xq_ref[...]                       # (B*Lq, E)
        xk = xk_ref[...]                       # (B*Lk, E)
        xv = xv_ref[...]

        ln0w, ln0b = vec_ref[0], vec_ref[1]
        ln1w, ln1b = vec_ref[2], vec_ref[3]
        bo, fc2b, fc4b = vec_ref[4], vec_ref[5], vec_ref[6]

        # ---- pre-norm (maybe_layer_norm(0, ., before=True)) ----
        q_in = _layer_norm(xq, ln0w, ln0b)
        k_in = _layer_norm(xk, ln0w, ln0b)
        v_in = _layer_norm(xv, ln0w, ln0b)

        # ---- full-width QKV projections (bf16 operands, f32 accumulate) ----
        bq, bk, bv = b_qkv_ref[0], b_qkv_ref[1], b_qkv_ref[2]
        q_all = jnp.dot(q_in.astype(jnp.bfloat16), w_qkv_ref[0],
                        preferred_element_type=jnp.float32) + bq   # scale folded in
        k_all = jnp.dot(k_in.astype(jnp.bfloat16), w_qkv_ref[1],
                        preferred_element_type=jnp.float32) + bk
        v_all = jnp.dot(v_in.astype(jnp.bfloat16), w_qkv_ref[2],
                        preferred_element_type=jnp.float32) + bv

        def split_heads(t):                    # (L, E) -> (H, L, hd)
            return jnp.stack([t[:, h * hd:(h + 1) * hd] for h in range(H)], axis=0)

        # ---- attention core, per batch element (B is tiny & static) ----
        w_o = w_o_ref[...]                     # (E, E) bf16
        attn_parts = []
        for b in range(B):
            qh = split_heads(q_all[b * Lq:(b + 1) * Lq])   # (H, Lq, hd)
            kh = split_heads(k_all[b * Lk:(b + 1) * Lk])   # (H, Lk, hd)
            vh = split_heads(v_all[b * Lk:(b + 1) * Lk])   # (H, Lk, hd)

            s = jnp.einsum('hqd,hkd->hqk', qh, kh,
                           preferred_element_type=jnp.float32)     # (H, Lq, Lk)
            s = s - jnp.max(s, axis=-1, keepdims=True)
            e = jnp.exp(s)
            # divide -> EUP reciprocal (VALU slot freed)
            p = e * pl.reciprocal(jnp.sum(e, axis=-1, keepdims=True), approx=True)
            ctx = jnp.einsum('hqk,hkd->hqd', p, vh,
                             preferred_element_type=jnp.float32)   # (H, Lq, hd)

            # merge heads on the lane dim, then ONE out-projection matmul
            ctx_cat = jnp.concatenate([ctx[h] for h in range(H)], axis=-1)  # (Lq, E)
            attn_parts.append(jnp.dot(ctx_cat.astype(jnp.bfloat16), w_o,
                                      preferred_element_type=jnp.float32))
        attn = (jnp.concatenate(attn_parts, axis=0) if B > 1 else attn_parts[0]) + bo

        # residual (res_dropout is identity in eval); post-norm skipped (pre-norm mode)
        x = xq + attn

        # ---- query-branch FFN ----
        h1 = _layer_norm(x, ln1w, ln1b)
        h1 = _gelu(jnp.dot(h1.astype(jnp.bfloat16), w_ffn_in_ref[0],
                           preferred_element_type=jnp.float32) + b_ffn_in_ref[0])
        h1 = jnp.dot(h1.astype(jnp.bfloat16), w_ffn_out_ref[0],
                     preferred_element_type=jnp.float32) + fc2b
        outq_ref[...] = _lane_pack(x + h1, gq)         # lane-dense unmasked store

        # ---- key-branch FFN (acts on the ORIGINAL x_k input) ----
        h2 = _layer_norm(xk, ln1w, ln1b)
        h2 = _gelu(jnp.dot(h2.astype(jnp.bfloat16), w_ffn_in_ref[1],
                           preferred_element_type=jnp.float32) + b_ffn_in_ref[1])
        h2 = jnp.dot(h2.astype(jnp.bfloat16), w_ffn_out_ref[1],
                     preferred_element_type=jnp.float32) + fc4b
        outk_ref[...] = _lane_pack(xk + h2, gk)        # lane-dense unmasked store

    return kernel


# -------------------------------- wrapper ----------------------------------

def init_params(key, embed=EMBED):
    """Deterministic xavier-uniform weights, zero biases, unit LayerNorm."""
    hidden = 4 * embed

    def xavier(k, fan_in, fan_out):
        a = math.sqrt(6.0 / (fan_in + fan_out))
        return jax.random.uniform(k, (fan_in, fan_out), jnp.float32, -a, a)

    ks = jax.random.split(key, 8)
    zeros_e = jnp.zeros((1, embed), jnp.float32)
    zeros_h = jnp.zeros((1, hidden), jnp.float32)
    ones_e = jnp.ones((1, embed), jnp.float32)

    params = [
        ones_e, zeros_e,                              # ln0 weight / bias
        xavier(ks[0], embed, embed), zeros_e,         # Wq, bq
        xavier(ks[1], embed, embed), zeros_e,         # Wk, bk
        xavier(ks[2], embed, embed), zeros_e,         # Wv, bv
        xavier(ks[3], embed, embed), zeros_e,         # Wo, bo
        ones_e, zeros_e,                              # ln1 weight / bias
        xavier(ks[4], embed, hidden), zeros_h,        # fc1
        xavier(ks[5], hidden, embed), zeros_e,        # fc2
        xavier(ks[6], embed, hidden), zeros_h,        # fc3
        xavier(ks[7], hidden, embed), zeros_e,        # fc4
    ]
    return params


def pack_params(params):
    """Pack the 20 raw parameter arrays into 7 slabs; weights cast to bf16 and
    the 1/sqrt(head_dim) scale folded into Wq / bq."""
    (ln0w, ln0b, wq, bq, wk, bk, wv, bv, wo, bo,
     ln1w, ln1b, fc1w, fc1b, fc2w, fc2b, fc3w, fc3b, fc4w, fc4b) = params
    E = wq.shape[0]
    HID = fc1w.shape[1]
    scale = 1.0 / math.sqrt(E // HEADS)

    w_qkv = jnp.stack([wq * scale, wk, wv]).astype(jnp.bfloat16)       # (3,E,E)
    b_qkv = jnp.stack([bq * scale, bk, bv])                            # (3,1,E) f32
    w_o = wo.astype(jnp.bfloat16)                                      # (E,E)
    w_ffn_in = jnp.stack([fc1w, fc3w]).astype(jnp.bfloat16)            # (2,E,HID)
    b_ffn_in = jnp.stack([fc1b, fc3b])                                 # (2,1,HID) f32
    w_ffn_out = jnp.stack([fc2w, fc4w]).astype(jnp.bfloat16)           # (2,HID,E)
    vec = jnp.stack([ln0w, ln0b, ln1w, ln1b, bo, fc2b, fc4b,
                     jnp.zeros_like(ln0w)])                            # (8,1,E) f32
    return (w_qkv, b_qkv, w_o, w_ffn_in, b_ffn_in, w_ffn_out, vec)


def transformer_encoder_layer_qkv(x_q, x_k, x_v, params):
    """x_q: (Lq, B, E), x_k/x_v: (Lk, B, E).  Returns (out_q, out_k) in the same
    (seq, batch, embed) layout as the PyTorch module."""
    Lq, B, E = x_q.shape
    Lk = x_k.shape[0]
    assert E % HEADS == 0

    # Batch-major row-flattening (row index = b*L + l); cheap XLA ops at this size.
    xq_rows = jnp.transpose(x_q, (1, 0, 2)).reshape(B * Lq, E)
    xk_rows = jnp.transpose(x_k, (1, 0, 2)).reshape(B * Lk, E)
    xv_rows = jnp.transpose(x_v, (1, 0, 2)).reshape(B * Lk, E)

    gq = _row_group(B * Lq, E)   # rows packed per 128-lane output row
    gk = _row_group(B * Lk, E)

    packed = pack_params(params)
    kernel = _make_kernel(B, Lq, Lk, E, HEADS, gq, gk)

    def full_spec(shape):
        nd = len(shape)
        return pl.BlockSpec(shape, lambda i, _nd=nd: (0,) * _nd)

    operands = (xq_rows, xk_rows, xv_rows) + packed
    in_specs = [full_spec(a.shape) for a in operands]

    outq_shape = (B * Lq // gq, gq * E)
    outk_shape = (B * Lk // gk, gk * E)
    out_shape = (jax.ShapeDtypeStruct(outq_shape, jnp.float32),
                 jax.ShapeDtypeStruct(outk_shape, jnp.float32))
    out_specs = (full_spec(outq_shape), full_spec(outk_shape))

    # Whole problem in a single grid step: the entire working set (~50 KB) fits
    # VMEM with huge headroom on v5e/v6e (128 MiB) and v7x (64 MiB), so no
    # vmem_limit override is needed.
    outq_d, outk_d = pl.pallas_call(
        kernel,
        out_shape=out_shape,
        grid=(1,),
        in_specs=in_specs,
        out_specs=out_specs,
        compiler_params=pltpu.CompilerParams(
            dimension_semantics=("arbitrary",)),
    )(*operands)

    out_q = _host_unpack(outq_d, gq, E).reshape(B, Lq, E).transpose(1, 0, 2)
    out_k = _host_unpack(outk_d, gk, E).reshape(B, Lk, E).transpose(1, 0, 2)
    return out_q, out_k


# ------------------------- pure-JAX reference (check) -----------------------

def reference(x_q, x_k, x_v, params):
    (ln0w, ln0b, wq, bq, wk, bk, wv, bv, wo, bo,
     ln1w, ln1b, fc1w, fc1b, fc2w, fc2b, fc3w, fc3b, fc4w, fc4b) = params

    def ln(x, w, b):
        mu = x.mean(-1, keepdims=True)
        var = ((x - mu) ** 2).mean(-1, keepdims=True)
        return (x - mu) / jnp.sqrt(var + LN_EPS) * w[0] + b[0]

    def gelu(x):
        return 0.5 * x * (1.0 + jax.lax.erf(x / math.sqrt(2.0)))

    Lq, B, E = x_q.shape
    Lk = x_k.shape[0]
    hd = E // HEADS

    q = ln(x_q, ln0w, ln0b) @ wq + bq[0]
    k = ln(x_k, ln0w, ln0b) @ wk + bk[0]
    v = ln(x_v, ln0w, ln0b) @ wv + bv[0]

    q = q.reshape(Lq, B, HEADS, hd) / math.sqrt(hd)
    k = k.reshape(Lk, B, HEADS, hd)
    v = v.reshape(Lk, B, HEADS, hd)

    scores = jnp.einsum("qbhd,kbhd->bhqk", q, k)
    p = jax.nn.softmax(scores, axis=-1)
    attn = jnp.einsum("bhqk,kbhd->qbhd", p, v).reshape(Lq, B, E)
    attn = attn @ wo + bo[0]

    x = x_q + attn
    h = ln(x, ln1w, ln1b)
    h = gelu(h @ fc1w + fc1b[0]) @ fc2w + fc2b[0]
    out_q = x + h

    hk = ln(x_k, ln1w, ln1b)
    hk = gelu(hk @ fc3w + fc3b[0]) @ fc4w + fc4b[0]
    out_k = x_k + hk
    return out_q, out_k


# ----------------------------------- main -----------------------------------

if __name__ == "__main__":
    key = jax.random.PRNGKey(0)
    k_x, k_k, k_v, k_p = jax.random.split(key, 4)

    Lq, Lk, B, E = 8, 16, 2, EMBED
    x_q = jax.random.normal(k_x, (Lq, B, E), jnp.float32)
    x_k = jax.random.normal(k_k, (Lk, B, E), jnp.float32)
    x_v = jax.random.normal(k_v, (Lk, B, E), jnp.float32)

    params = init_params(k_p, E)

    out_q, out_k = transformer_encoder_layer_qkv(x_q, x_k, x_v, params)
    out_q = jax.block_until_ready(out_q)
    out_k = jax.block_until_ready(out_k)

    ref_q, ref_k = reference(x_q, x_k, x_v, params)
    assert out_q.shape == (Lq, B, E) and out_k.shape == (Lk, B, E)
    # bf16 MXU operands (per perf review) -> slightly looser tolerance than pure f32.
    err_q = float(jnp.max(jnp.abs(out_q - ref_q)))
    err_k = float(jnp.max(jnp.abs(out_k - ref_k)))
    assert jnp.allclose(out_q, ref_q, rtol=2e-2, atol=2e-2), err_q
    assert jnp.allclose(out_k, ref_k, rtol=2e-2, atol=2e-2), err_k

    print("KERNEL_OK")
</pallas_src>

<mosaic_0001>
module attributes {stable_mosaic.version = 11 : i64} {
  func.func @kernel(%arg0: i32, %arg1: memref<16x32xf32, #tpu.memory_space<vmem>>, %arg2: memref<32x32xf32, #tpu.memory_space<vmem>>, %arg3: memref<32x32xf32, #tpu.memory_space<vmem>>, %arg4: memref<3x32x32xbf16, #tpu.memory_space<vmem>>, %arg5: memref<3x1x32xf32, #tpu.memory_space<vmem>>, %arg6: memref<32x32xbf16, #tpu.memory_space<vmem>>, %arg7: memref<2x32x128xbf16, #tpu.memory_space<vmem>>, %arg8: memref<2x1x128xf32, #tpu.memory_space<vmem>>, %arg9: memref<2x128x32xbf16, #tpu.memory_space<vmem>>, %arg10: memref<8x1x32xf32, #tpu.memory_space<vmem>>, %arg11: memref<4x128xf32, #tpu.memory_space<vmem>>, %arg12: memref<8x128xf32, #tpu.memory_space<vmem>>) attributes {dimension_semantics = [#tpu.dimension_semantics<arbitrary>], iteration_bounds = array<i64: 1>, scalar_prefetch = 0 : i64, scratch_operands = 0 : i64, tpu.core_type = #tpu.core_type<tc>, window_params = [{pipeline_mode = #tpu.pipeline_mode<synchronous>, transform_indices = @transform_0, window_bounds = array<i64: 16, 32>}, {pipeline_mode = #tpu.pipeline_mode<synchronous>, transform_indices = @transform_1, window_bounds = array<i64: 32, 32>}, {pipeline_mode = #tpu.pipeline_mode<synchronous>, transform_indices = @transform_2, window_bounds = array<i64: 32, 32>}, {pipeline_mode = #tpu.pipeline_mode<synchronous>, transform_indices = @transform_3, window_bounds = array<i64: 3, 32, 32>}, {pipeline_mode = #tpu.pipeline_mode<synchronous>, transform_indices = @transform_4, window_bounds = array<i64: 3, 1, 32>}, {pipeline_mode = #tpu.pipeline_mode<synchronous>, transform_indices = @transform_5, window_bounds = array<i64: 32, 32>}, {pipeline_mode = #tpu.pipeline_mode<synchronous>, transform_indices = @transform_6, window_bounds = array<i64: 2, 32, 128>}, {pipeline_mode = #tpu.pipeline_mode<synchronous>, transform_indices = @transform_7, window_bounds = array<i64: 2, 1, 128>}, {pipeline_mode = #tpu.pipeline_mode<synchronous>, transform_indices = @transform_8, window_bounds = array<i64: 2, 128, 32>}, {pipeline_mode = #tpu.pipeline_mode<synchronous>, transform_indices = @transform_9, window_bounds = array<i64: 8, 1, 32>}, {pipeline_mode = #tpu.pipeline_mode<synchronous>, transform_indices = @transform_10, window_bounds = array<i64: 4, 128>}, {pipeline_mode = #tpu.pipeline_mode<synchronous>, transform_indices = @transform_11, window_bounds = array<i64: 8, 128>}]} {
    %c0 = arith.constant 0 : index
    %c0_0 = arith.constant 0 : index
    %0 = vector.load %arg1[%c0, %c0_0] : memref<16x32xf32, #tpu.memory_space<vmem>>, vector<16x32xf32>
    %c0_1 = arith.constant 0 : index
    %c0_2 = arith.constant 0 : index
    %1 = vector.load %arg2[%c0_1, %c0_2] : memref<32x32xf32, #tpu.memory_space<vmem>>, vector<32x32xf32>
    %c0_3 = arith.constant 0 : index
    %c0_4 = arith.constant 0 : index
    %2 = vector.load %arg3[%c0_3, %c0_4] : memref<32x32xf32, #tpu.memory_space<vmem>>, vector<32x32xf32>
    %c0_5 = arith.constant 0 : index
    %c0_6 = arith.constant 0 : index
    %c0_7 = arith.constant 0 : index
    %3 = vector.load %arg10[%c0_5, %c0_6, %c0_7] : memref<8x1x32xf32, #tpu.memory_space<vmem>>, vector<1x1x32xf32>
    %4 = vector.shape_cast %3 : vector<1x1x32xf32> to vector<1x32xf32>
    %c1 = arith.constant 1 : index
    %c0_8 = arith.constant 0 : index
    %c0_9 = arith.constant 0 : index
    %5 = vector.load %arg10[%c1, %c0_8, %c0_9] : memref<8x1x32xf32, #tpu.memory_space<vmem>>, vector<1x1x32xf32>
    %6 = vector.shape_cast %5 : vector<1x1x32xf32> to vector<1x32xf32>
    %c2 = arith.constant 2 : index
    %c0_10 = arith.constant 0 : index
    %c0_11 = arith.constant 0 : index
    %7 = vector.load %arg10[%c2, %c0_10, %c0_11] : memref<8x1x32xf32, #tpu.memory_space<vmem>>, vector<1x1x32xf32>
    %8 = vector.shape_cast %7 : vector<1x1x32xf32> to vector<1x32xf32>
    %c3 = arith.constant 3 : index
    %c0_12 = arith.constant 0 : index
    %c0_13 = arith.constant 0 : index
    %9 = vector.load %arg10[%c3, %c0_12, %c0_13] : memref<8x1x32xf32, #tpu.memory_space<vmem>>, vector<1x1x32xf32>
    %10 = vector.shape_cast %9 : vector<1x1x32xf32> to vector<1x32xf32>
    %c4 = arith.constant 4 : index
    %c0_14 = arith.constant 0 : index
    %c0_15 = arith.constant 0 : index
    %11 = vector.load %arg10[%c4, %c0_14, %c0_15] : memref<8x1x32xf32, #tpu.memory_space<vmem>>, vector<1x1x32xf32>
    %12 = vector.shape_cast %11 : vector<1x1x32xf32> to vector<1x32xf32>
    %c5 = arith.constant 5 : index
    %c0_16 = arith.constant 0 : index
    %c0_17 = arith.constant 0 : index
    %13 = vector.load %arg10[%c5, %c0_16, %c0_17] : memref<8x1x32xf32, #tpu.memory_space<vmem>>, vector<1x1x32xf32>
    %14 = vector.shape_cast %13 : vector<1x1x32xf32> to vector<1x32xf32>
    %c6 = arith.constant 6 : index
    %c0_18 = arith.constant 0 : index
    %c0_19 = arith.constant 0 : index
    %15 = vector.load %arg10[%c6, %c0_18, %c0_19] : memref<8x1x32xf32, #tpu.memory_space<vmem>>, vector<1x1x32xf32>
    %16 = vector.shape_cast %15 : vector<1x1x32xf32> to vector<1x32xf32>
    %cst = arith.constant dense<0.000000e+00> : vector<16xf32>
    %17 = vector.multi_reduction <add>, %0, %cst [1] : vector<16x32xf32> to vector<16xf32>
    %18 = vector.shape_cast %17 : vector<16xf32> to vector<16x1xf32>
    %cst_20 = arith.constant 3.200000e+01 : f32
    %19 = vector.broadcast %cst_20 : f32 to vector<16x1xf32>
    %20 = arith.divf %18, %19 : vector<16x1xf32>
    %21 = vector.broadcast %20 : vector<16x1xf32> to vector<16x32xf32>
    %22 = arith.subf %0, %21 : vector<16x32xf32>
    %23 = arith.mulf %22, %22 : vector<16x32xf32>
    %cst_21 = arith.constant dense<0.000000e+00> : vector<16xf32>
    %24 = vector.multi_reduction <add>, %23, %cst_21 [1] : vector<16x32xf32> to vector<16xf32>
    %25 = vector.shape_cast %24 : vector<16xf32> to vector<16x1xf32>
    %cst_22 = arith.constant 3.200000e+01 : f32
    %26 = vector.broadcast %cst_22 : f32 to vector<16x1xf32>
    %27 = arith.divf %25, %26 : vector<16x1xf32>
    %cst_23 = arith.constant 9.99999974E-6 : f32
    %28 = vector.broadcast %cst_23 : f32 to vector<16x1xf32>
    %29 = arith.addf %27, %28 : vector<16x1xf32>
    %30 = math.rsqrt %29 : vector<16x1xf32>
    %31 = vector.broadcast %30 : vector<16x1xf32> to vector<16x32xf32>
    %32 = arith.mulf %22, %31 : vector<16x32xf32>
    %33 = vector.broadcast %4 : vector<1x32xf32> to vector<16x32xf32>
    %34 = arith.mulf %32, %33 : vector<16x32xf32>
    %35 = vector.broadcast %6 : vector<1x32xf32> to vector<16x32xf32>
    %36 = arith.addf %34, %35 : vector<16x32xf32>
    %cst_24 = arith.constant dense<0.000000e+00> : vector<32xf32>
    %37 = vector.multi_reduction <add>, %1, %cst_24 [1] : vector<32x32xf32> to vector<32xf32>
    %38 = vector.shape_cast %37 : vector<32xf32> to vector<32x1xf32>
    %cst_25 = arith.constant 3.200000e+01 : f32
    %39 = vector.broadcast %cst_25 : f32 to vector<32x1xf32>
    %40 = arith.divf %38, %39 : vector<32x1xf32>
    %41 = vector.broadcast %40 : vector<32x1xf32> to vector<32x32xf32>
    %42 = arith.subf %1, %41 : vector<32x32xf32>
    %43 = arith.mulf %42, %42 : vector<32x32xf32>
    %cst_26 = arith.constant dense<0.000000e+00> : vector<32xf32>
    %44 = vector.multi_reduction <add>, %43, %cst_26 [1] : vector<32x32xf32> to vector<32xf32>
    %45 = vector.shape_cast %44 : vector<32xf32> to vector<32x1xf32>
    %cst_27 = arith.constant 3.200000e+01 : f32
    %46 = vector.broadcast %cst_27 : f32 to vector<32x1xf32>
    %47 = arith.divf %45, %46 : vector<32x1xf32>
    %cst_28 = arith.constant 9.99999974E-6 : f32
    %48 = vector.broadcast %cst_28 : f32 to vector<32x1xf32>
    %49 = arith.addf %47, %48 : vector<32x1xf32>
    %50 = math.rsqrt %49 : vector<32x1xf32>
    %51 = vector.broadcast %50 : vector<32x1xf32> to vector<32x32xf32>
    %52 = arith.mulf %42, %51 : vector<32x32xf32>
    %53 = vector.broadcast %4 : vector<1x32xf32> to vector<32x32xf32>
    %54 = arith.mulf %52, %53 : vector<32x32xf32>
    %55 = vector.broadcast %6 : vector<1x32xf32> to vector<32x32xf32>
    %56 = arith.addf %54, %55 : vector<32x32xf32>
    %cst_29 = arith.constant dense<0.000000e+00> : vector<32xf32>
    %57 = vector.multi_reduction <add>, %2, %cst_29 [1] : vector<32x32xf32> to vector<32xf32>
    %58 = vector.shape_cast %57 : vector<32xf32> to vector<32x1xf32>
    %cst_30 = arith.constant 3.200000e+01 : f32
    %59 = vector.broadcast %cst_30 : f32 to vector<32x1xf32>
    %60 = arith.divf %58, %59 : vector<32x1xf32>
    %61 = vector.broadcast %60 : vector<32x1xf32> to vector<32x32xf32>
    %62 = arith.subf %2, %61 : vector<32x32xf32>
    %63 = arith.mulf %62, %62 : vector<32x32xf32>
    %cst_31 = arith.constant dense<0.000000e+00> : vector<32xf32>
    %64 = vector.multi_reduction <add>, %63, %cst_31 [1] : vector<32x32xf32> to vector<32xf32>
    %65 = vector.shape_cast %64 : vector<32xf32> to vector<32x1xf32>
    %cst_32 = arith.constant 3.200000e+01 : f32
    %66 = vector.broadcast %cst_32 : f32 to vector<32x1xf32>
    %67 = arith.divf %65, %66 : vector<32x1xf32>
    %cst_33 = arith.constant 9.99999974E-6 : f32
    %68 = vector.broadcast %cst_33 : f32 to vector<32x1xf32>
    %69 = arith.addf %67, %68 : vector<32x1xf32>
    %70 = math.rsqrt %69 : vector<32x1xf32>
    %71 = vector.broadcast %70 : vector<32x1xf32> to vector<32x32xf32>
    %72 = arith.mulf %62, %71 : vector<32x32xf32>
    %73 = vector.broadcast %4 : vector<1x32xf32> to vector<32x32xf32>
    %74 = arith.mulf %72, %73 : vector<32x32xf32>
    %75 = vector.broadcast %6 : vector<1x32xf32> to vector<32x32xf32>
    %76 = arith.addf %74, %75 : vector<32x32xf32>
    %c0_34 = arith.constant 0 : index
    %c0_35 = arith.constant 0 : index
    %c0_36 = arith.constant 0 : index
    %77 = vector.load %arg5[%c0_34, %c0_35, %c0_36] : memref<3x1x32xf32, #tpu.memory_space<vmem>>, vector<1x1x32xf32>
    %78 = vector.shape_cast %77 : vector<1x1x32xf32> to vector<1x32xf32>
    %c1_37 = arith.constant 1 : index
    %c0_38 = arith.constant 0 : index
    %c0_39 = arith.constant 0 : index
    %79 = vector.load %arg5[%c1_37, %c0_38, %c0_39] : memref<3x1x32xf32, #tpu.memory_space<vmem>>, vector<1x1x32xf32>
    %80 = vector.shape_cast %79 : vector<1x1x32xf32> to vector<1x32xf32>
    %c2_40 = arith.constant 2 : index
    %c0_41 = arith.constant 0 : index
    %c0_42 = arith.constant 0 : index
    %81 = vector.load %arg5[%c2_40, %c0_41, %c0_42] : memref<3x1x32xf32, #tpu.memory_space<vmem>>, vector<1x1x32xf32>
    %82 = vector.shape_cast %81 : vector<1x1x32xf32> to vector<1x32xf32>
    %83 = arith.truncf %36 : vector<16x32xf32> to vector<16x32xbf16>
    %c0_43 = arith.constant 0 : index
    %c0_44 = arith.constant 0 : index
    %c0_45 = arith.constant 0 : index
    %84 = vector.load %arg4[%c0_43, %c0_44, %c0_45] : memref<3x32x32xbf16, #tpu.memory_space<vmem>>, vector<1x32x32xbf16>
    %85 = vector.shape_cast %84 : vector<1x32x32xbf16> to vector<32x32xbf16>
    %cst_46 = arith.constant dense<0.000000e+00> : vector<16x32xf32>
    %86 = tpu.matmul %83, %85, %cst_46 {dimension_numbers = #tpu.dot_dimension_numbers<[1], [0], [0], [1], [0, 0, 1, 1], [], []>} : vector<16x32xbf16>, vector<32x32xbf16>, vector<16x32xf32> -> vector<16x32xf32>
    %87 = vector.broadcast %78 : vector<1x32xf32> to vector<16x32xf32>
    %88 = arith.addf %86, %87 : vector<16x32xf32>
    %89 = arith.truncf %56 : vector<32x32xf32> to vector<32x32xbf16>
    %c1_47 = arith.constant 1 : index
    %c0_48 = arith.constant 0 : index
    %c0_49 = arith.constant 0 : index
    %90 = vector.load %arg4[%c1_47, %c0_48, %c0_49] : memref<3x32x32xbf16, #tpu.memory_space<vmem>>, vector<1x32x32xbf16>
    %91 = vector.shape_cast %90 : vector<1x32x32xbf16> to vector<32x32xbf16>
    %cst_50 = arith.constant dense<0.000000e+00> : vector<32x32xf32>
    %92 = tpu.matmul %89, %91, %cst_50 {dimension_numbers = #tpu.dot_dimension_numbers<[1], [0], [0], [1], [0, 0, 1, 1], [], []>} : vector<32x32xbf16>, vector<32x32xbf16>, vector<32x32xf32> -> vector<32x32xf32>
    %93 = vector.broadcast %80 : vector<1x32xf32> to vector<32x32xf32>
    %94 = arith.addf %92, %93 : vector<32x32xf32>
    %95 = arith.truncf %76 : vector<32x32xf32> to vector<32x32xbf16>
    %c2_51 = arith.constant 2 : index
    %c0_52 = arith.constant 0 : index
    %c0_53 = arith.constant 0 : index
    %96 = vector.load %arg4[%c2_51, %c0_52, %c0_53] : memref<3x32x32xbf16, #tpu.memory_space<vmem>>, vector<1x32x32xbf16>
    %97 = vector.shape_cast %96 : vector<1x32x32xbf16> to vector<32x32xbf16>
    %cst_54 = arith.constant dense<0.000000e+00> : vector<32x32xf32>
    %98 = tpu.matmul %95, %97, %cst_54 {dimension_numbers = #tpu.dot_dimension_numbers<[1], [0], [0], [1], [0, 0, 1, 1], [], []>} : vector<32x32xbf16>, vector<32x32xbf16>, vector<32x32xf32> -> vector<32x32xf32>
    %99 = vector.broadcast %82 : vector<1x32xf32> to vector<32x32xf32>
    %100 = arith.addf %98, %99 : vector<32x32xf32>
    %c0_55 = arith.constant 0 : index
    %c0_56 = arith.constant 0 : index
    %101 = vector.load %arg6[%c0_55, %c0_56] : memref<32x32xbf16, #tpu.memory_space<vmem>>, vector<32x32xbf16>
    %102 = vector.extract_strided_slice %88 {offsets = [0, 0], sizes = [8, 32], strides = [1, 1]} : vector<16x32xf32> to vector<8x32xf32>
    %103 = vector.extract_strided_slice %102 {offsets = [0, 0], sizes = [8, 8], strides = [1, 1]} : vector<8x32xf32> to vector<8x8xf32>
    %104 = vector.extract_strided_slice %102 {offsets = [0, 8], sizes = [8, 8], strides = [1, 1]} : vector<8x32xf32> to vector<8x8xf32>
    %105 = vector.extract_strided_slice %102 {offsets = [0, 16], sizes = [8, 8], strides = [1, 1]} : vector<8x32xf32> to vector<8x8xf32>
    %106 = vector.extract_strided_slice %102 {offsets = [0, 24], sizes = [8, 8], strides = [1, 1]} : vector<8x32xf32> to vector<8x8xf32>
    %107 = vector.shape_cast %103 : vector<8x8xf32> to vector<1x8x8xf32>
    %108 = vector.shape_cast %104 : vector<8x8xf32> to vector<1x8x8xf32>
    %109 = vector.shape_cast %105 : vector<8x8xf32> to vector<1x8x8xf32>
    %110 = vector.shape_cast %106 : vector<8x8xf32> to vector<1x8x8xf32>
    %111 = tpu.concatenate %107, %108, %109, %110 in 0 : vector<1x8x8xf32>, vector<1x8x8xf32>, vector<1x8x8xf32>, vector<1x8x8xf32> -> vector<4x8x8xf32>
    %112 = vector.extract_strided_slice %94 {offsets = [0, 0], sizes = [16, 32], strides = [1, 1]} : vector<32x32xf32> to vector<16x32xf32>
    %113 = vector.extract_strided_slice %112 {offsets = [0, 0], sizes = [16, 8], strides = [1, 1]} : vector<16x32xf32> to vector<16x8xf32>
    %114 = vector.extract_strided_slice %112 {offsets = [0, 8], sizes = [16, 8], strides = [1, 1]} : vector<16x32xf32> to vector<16x8xf32>
    %115 = vector.extract_strided_slice %112 {offsets = [0, 16], sizes = [16, 8], strides = [1, 1]} : vector<16x32xf32> to vector<16x8xf32>
    %116 = vector.extract_strided_slice %112 {offsets = [0, 24], sizes = [16, 8], strides = [1, 1]} : vector<16x32xf32> to vector<16x8xf32>
    %117 = vector.shape_cast %113 : vector<16x8xf32> to vector<1x16x8xf32>
    %118 = vector.shape_cast %114 : vector<16x8xf32> to vector<1x16x8xf32>
    %119 = vector.shape_cast %115 : vector<16x8xf32> to vector<1x16x8xf32>
    %120 = vector.shape_cast %116 : vector<16x8xf32> to vector<1x16x8xf32>
    %121 = tpu.concatenate %117, %118, %119, %120 in 0 : vector<1x16x8xf32>, vector<1x16x8xf32>, vector<1x16x8xf32>, vector<1x16x8xf32> -> vector<4x16x8xf32>
    %122 = vector.extract_strided_slice %100 {offsets = [0, 0], sizes = [16, 32], strides = [1, 1]} : vector<32x32xf32> to vector<16x32xf32>
    %123 = vector.extract_strided_slice %122 {offsets = [0, 0], sizes = [16, 8], strides = [1, 1]} : vector<16x32xf32> to vector<16x8xf32>
    %124 = vector.extract_strided_slice %122 {offsets = [0, 8], sizes = [16, 8], strides = [1, 1]} : vector<16x32xf32> to vector<16x8xf32>
    %125 = vector.extract_strided_slice %122 {offsets = [0, 16], sizes = [16, 8], strides = [1, 1]} : vector<16x32xf32> to vector<16x8xf32>
    %126 = vector.extract_strided_slice %122 {offsets = [0, 24], sizes = [16, 8], strides = [1, 1]} : vector<16x32xf32> to vector<16x8xf32>
    %127 = vector.shape_cast %123 : vector<16x8xf32> to vector<1x16x8xf32>
    %128 = vector.shape_cast %124 : vector<16x8xf32> to vector<1x16x8xf32>
    %129 = vector.shape_cast %125 : vector<16x8xf32> to vector<1x16x8xf32>
    %130 = vector.shape_cast %126 : vector<16x8xf32> to vector<1x16x8xf32>
    %131 = tpu.concatenate %127, %128, %129, %130 in 0 : vector<1x16x8xf32>, vector<1x16x8xf32>, vector<1x16x8xf32>, vector<1x16x8xf32> -> vector<4x16x8xf32>
    "tpu.trace_start"() <{level = 10 : i32, message = "hqd,hkd->hqk"}> : () -> ()
    %cst_57 = arith.constant dense<0.000000e+00> : vector<4x8x16xf32>
    %132 = tpu.matmul %111, %121, %cst_57 {dimension_numbers = #tpu.dot_dimension_numbers<[2], [2], [1], [1], [0, 0, 0, 1, 1, 1], [0], [0]>} : vector<4x8x8xf32>, vector<4x16x8xf32>, vector<4x8x16xf32> -> vector<4x8x16xf32>
    "tpu.trace_stop"() : () -> ()
    %cst_58 = arith.constant dense<0xFF800000> : vector<4x8xf32>
    %133 = vector.multi_reduction <maximumf>, %132, %cst_58 [2] : vector<4x8x16xf32> to vector<4x8xf32>
    %134 = vector.shape_cast %133 : vector<4x8xf32> to vector<4x8x1xf32>
    %135 = vector.broadcast %134 : vector<4x8x1xf32> to vector<4x8x16xf32>
    %136 = arith.subf %132, %135 : vector<4x8x16xf32>
    %137 = math.exp %136 : vector<4x8x16xf32>
    %cst_59 = arith.constant dense<0.000000e+00> : vector<4x8xf32>
    %138 = vector.multi_reduction <add>, %137, %cst_59 [2] : vector<4x8x16xf32> to vector<4x8xf32>
    %139 = vector.shape_cast %138 : vector<4x8xf32> to vector<4x8x1xf32>
    %140 = tpu.reciprocal %139 {approx = true} : vector<4x8x1xf32> -> vector<4x8x1xf32>
    %141 = vector.broadcast %140 : vector<4x8x1xf32> to vector<4x8x16xf32>
    %142 = arith.mulf %137, %141 : vector<4x8x16xf32>
    "tpu.trace_start"() <{level = 10 : i32, message = "hqk,hkd->hqd"}> : () -> ()
    %cst_60 = arith.constant dense<0.000000e+00> : vector<4x8x8xf32>
    %143 = tpu.matmul %142, %131, %cst_60 {dimension_numbers = #tpu.dot_dimension_numbers<[2], [1], [1], [2], [0, 0, 0, 1, 1, 2], [0], [0]>} : vector<4x8x16xf32>, vector<4x16x8xf32>, vector<4x8x8xf32> -> vector<4x8x8xf32>
    "tpu.trace_stop"() : () -> ()
    %144 = vector.extract_strided_slice %143 {offsets = [0, 0, 0], sizes = [1, 8, 8], strides = [1, 1, 1]} : vector<4x8x8xf32> to vector<1x8x8xf32>
    %145 = vector.shape_cast %144 : vector<1x8x8xf32> to vector<8x8xf32>
    %146 = vector.extract_strided_slice %143 {offsets = [1, 0, 0], sizes = [1, 8, 8], strides = [1, 1, 1]} : vector<4x8x8xf32> to vector<1x8x8xf32>
    %147 = vector.shape_cast %146 : vector<1x8x8xf32> to vector<8x8xf32>
    %148 = vector.extract_strided_slice %143 {offsets = [2, 0, 0], sizes = [1, 8, 8], strides = [1, 1, 1]} : vector<4x8x8xf32> to vector<1x8x8xf32>
    %149 = vector.shape_cast %148 : vector<1x8x8xf32> to vector<8x8xf32>
    %150 = vector.extract_strided_slice %143 {offsets = [3, 0, 0], sizes = [1, 8, 8], strides = [1, 1, 1]} : vector<4x8x8xf32> to vector<1x8x8xf32>
    %151 = vector.shape_cast %150 : vector<1x8x8xf32> to vector<8x8xf32>
    %152 = tpu.concatenate %145, %147, %149, %151 in 1 : vector<8x8xf32>, vector<8x8xf32>, vector<8x8xf32>, vector<8x8xf32> -> vector<8x32xf32>
    %153 = arith.truncf %152 : vector<8x32xf32> to vector<8x32xbf16>
    %cst_61 = arith.constant dense<0.000000e+00> : vector<8x32xf32>
    %154 = tpu.matmul %153, %101, %cst_61 {dimension_numbers = #tpu.dot_dimension_numbers<[1], [0], [0], [1], [0, 0, 1, 1], [], []>} : vector<8x32xbf16>, vector<32x32xbf16>, vector<8x32xf32> -> vector<8x32xf32>
    %155 = vector.extract_strided_slice %88 {offsets = [8, 0], sizes = [8, 32], strides = [1, 1]} : vector<16x32xf32> to vector<8x32xf32>
    %156 = vector.extract_strided_slice %155 {offsets = [0, 0], sizes = [8, 8], strides = [1, 1]} : vector<8x32xf32> to vector<8x8xf32>
    %157 = vector.extract_strided_slice %155 {offsets = [0, 8], sizes = [8, 8], strides = [1, 1]} : vector<8x32xf32> to vector<8x8xf32>
    %158 = vector.extract_strided_slice %155 {offsets = [0, 16], sizes = [8, 8], strides = [1, 1]} : vector<8x32xf32> to vector<8x8xf32>
    %159 = vector.extract_strided_slice %155 {offsets = [0, 24], sizes = [8, 8], strides = [1, 1]} : vector<8x32xf32> to vector<8x8xf32>
    %160 = vector.shape_cast %156 : vector<8x8xf32> to vector<1x8x8xf32>
    %161 = vector.shape_cast %157 : vector<8x8xf32> to vector<1x8x8xf32>
    %162 = vector.shape_cast %158 : vector<8x8xf32> to vector<1x8x8xf32>
    %163 = vector.shape_cast %159 : vector<8x8xf32> to vector<1x8x8xf32>
    %164 = tpu.concatenate %160, %161, %162, %163 in 0 : vector<1x8x8xf32>, vector<1x8x8xf32>, vector<1x8x8xf32>, vector<1x8x8xf32> -> vector<4x8x8xf32>
    %165 = vector.extract_strided_slice %94 {offsets = [16, 0], sizes = [16, 32], strides = [1, 1]} : vector<32x32xf32> to vector<16x32xf32>
    %166 = vector.extract_strided_slice %165 {offsets = [0, 0], sizes = [16, 8], strides = [1, 1]} : vector<16x32xf32> to vector<16x8xf32>
    %167 = vector.extract_strided_slice %165 {offsets = [0, 8], sizes = [16, 8], strides = [1, 1]} : vector<16x32xf32> to vector<16x8xf32>
    %168 = vector.extract_strided_slice %165 {offsets = [0, 16], sizes = [16, 8], strides = [1, 1]} : vector<16x32xf32> to vector<16x8xf32>
    %169 = vector.extract_strided_slice %165 {offsets = [0, 24], sizes = [16, 8], strides = [1, 1]} : vector<16x32xf32> to vector<16x8xf32>
    %170 = vector.shape_cast %166 : vector<16x8xf32> to vector<1x16x8xf32>
    %171 = vector.shape_cast %167 : vector<16x8xf32> to vector<1x16x8xf32>
    %172 = vector.shape_cast %168 : vector<16x8xf32> to vector<1x16x8xf32>
    %173 = vector.shape_cast %169 : vector<16x8xf32> to vector<1x16x8xf32>
    %174 = tpu.concatenate %170, %171, %172, %173 in 0 : vector<1x16x8xf32>, vector<1x16x8xf32>, vector<1x16x8xf32>, vector<1x16x8xf32> -> vector<4x16x8xf32>
    %175 = vector.extract_strided_slice %100 {offsets = [16, 0], sizes = [16, 32], strides = [1, 1]} : vector<32x32xf32> to vector<16x32xf32>
    %176 = vector.extract_strided_slice %175 {offsets = [0, 0], sizes = [16, 8], strides = [1, 1]} : vector<16x32xf32> to vector<16x8xf32>
    %177 = vector.extract_strided_slice %175 {offsets = [0, 8], sizes = [16, 8], strides = [1, 1]} : vector<16x32xf32> to vector<16x8xf32>
    %178 = vector.extract_strided_slice %175 {offsets = [0, 16], sizes = [16, 8], strides = [1, 1]} : vector<16x32xf32> to vector<16x8xf32>
    %179 = vector.extract_strided_slice %175 {offsets = [0, 24], sizes = [16, 8], strides = [1, 1]} : vector<16x32xf32> to vector<16x8xf32>
    %180 = vector.shape_cast %176 : vector<16x8xf32> to vector<1x16x8xf32>
    %181 = vector.shape_cast %177 : vector<16x8xf32> to vector<1x16x8xf32>
    %182 = vector.shape_cast %178 : vector<16x8xf32> to vector<1x16x8xf32>
    %183 = vector.shape_cast %179 : vector<16x8xf32> to vector<1x16x8xf32>
    %184 = tpu.concatenate %180, %181, %182, %183 in 0 : vector<1x16x8xf32>, vector<1x16x8xf32>, vector<1x16x8xf32>, vector<1x16x8xf32> -> vector<4x16x8xf32>
    "tpu.trace_start"() <{level = 10 : i32, message = "hqd,hkd->hqk"}> : () -> ()
    %cst_62 = arith.constant dense<0.000000e+00> : vector<4x8x16xf32>
    %185 = tpu.matmul %164, %174, %cst_62 {dimension_numbers = #tpu.dot_dimension_numbers<[2], [2], [1], [1], [0, 0, 0, 1, 1, 1], [0], [0]>} : vector<4x8x8xf32>, vector<4x16x8xf32>, vector<4x8x16xf32> -> vector<4x8x16xf32>
    "tpu.trace_stop"() : () -> ()
    %cst_63 = arith.constant dense<0xFF800000> : vector<4x8xf32>
    %186 = vector.multi_reduction <maximumf>, %185, %cst_63 [2] : vector<4x8x16xf32> to vector<4x8xf32>
    %187 = vector.shape_cast %186 : vector<4x8xf32> to vector<4x8x1xf32>
    %188 = vector.broadcast %187 : vector<4x8x1xf32> to vector<4x8x16xf32>
    %189 = arith.subf %185, %188 : vector<4x8x16xf32>
    %190 = math.exp %189 : vector<4x8x16xf32>
    %cst_64 = arith.constant dense<0.000000e+00> : vector<4x8xf32>
    %191 = vector.multi_reduction <add>, %190, %cst_64 [2] : vector<4x8x16xf32> to vector<4x8xf32>
    %192 = vector.shape_cast %191 : vector<4x8xf32> to vector<4x8x1xf32>
    %193 = tpu.reciprocal %192 {approx = true} : vector<4x8x1xf32> -> vector<4x8x1xf32>
    %194 = vector.broadcast %193 : vector<4x8x1xf32> to vector<4x8x16xf32>
    %195 = arith.mulf %190, %194 : vector<4x8x16xf32>
    "tpu.trace_start"() <{level = 10 : i32, message = "hqk,hkd->hqd"}> : () -> ()
    %cst_65 = arith.constant dense<0.000000e+00> : vector<4x8x8xf32>
    %196 = tpu.matmul %195, %184, %cst_65 {dimension_numbers = #tpu.dot_dimension_numbers<[2], [1], [1], [2], [0, 0, 0, 1, 1, 2], [0], [0]>} : vector<4x8x16xf32>, vector<4x16x8xf32>, vector<4x8x8xf32> -> vector<4x8x8xf32>
    "tpu.trace_stop"() : () -> ()
    %197 = vector.extract_strided_slice %196 {offsets = [0, 0, 0], sizes = [1, 8, 8], strides = [1, 1, 1]} : vector<4x8x8xf32> to vector<1x8x8xf32>
    %198 = vector.shape_cast %197 : vector<1x8x8xf32> to vector<8x8xf32>
    %199 = vector.extract_strided_slice %196 {offsets = [1, 0, 0], sizes = [1, 8, 8], strides = [1, 1, 1]} : vector<4x8x8xf32> to vector<1x8x8xf32>
    %200 = vector.shape_cast %199 : vector<1x8x8xf32> to vector<8x8xf32>
    %201 = vector.extract_strided_slice %196 {offsets = [2, 0, 0], sizes = [1, 8, 8], strides = [1, 1, 1]} : vector<4x8x8xf32> to vector<1x8x8xf32>
    %202 = vector.shape_cast %201 : vector<1x8x8xf32> to vector<8x8xf32>
    %203 = vector.extract_strided_slice %196 {offsets = [3, 0, 0], sizes = [1, 8, 8], strides = [1, 1, 1]} : vector<4x8x8xf32> to vector<1x8x8xf32>
    %204 = vector.shape_cast %203 : vector<1x8x8xf32> to vector<8x8xf32>
    %205 = tpu.concatenate %198, %200, %202, %204 in 1 : vector<8x8xf32>, vector<8x8xf32>, vector<8x8xf32>, vector<8x8xf32> -> vector<8x32xf32>
    %206 = arith.truncf %205 : vector<8x32xf32> to vector<8x32xbf16>
    %cst_66 = arith.constant dense<0.000000e+00> : vector<8x32xf32>
    %207 = tpu.matmul %206, %101, %cst_66 {dimension_numbers = #tpu.dot_dimension_numbers<[1], [0], [0], [1], [0, 0, 1, 1], [], []>} : vector<8x32xbf16>, vector<32x32xbf16>, vector<8x32xf32> -> vector<8x32xf32>
    %208 = tpu.concatenate %154, %207 in 0 : vector<8x32xf32>, vector<8x32xf32> -> vector<16x32xf32>
    %209 = vector.broadcast %12 : vector<1x32xf32> to vector<16x32xf32>
    %210 = arith.addf %208, %209 : vector<16x32xf32>
    %211 = arith.addf %0, %210 : vector<16x32xf32>
    %cst_67 = arith.constant dense<0.000000e+00> : vector<16xf32>
    %212 = vector.multi_reduction <add>, %211, %cst_67 [1] : vector<16x32xf32> to vector<16xf32>
    %213 = vector.shape_cast %212 : vector<16xf32> to vector<16x1xf32>
    %cst_68 = arith.constant 3.200000e+01 : f32
    %214 = vector.broadcast %cst_68 : f32 to vector<16x1xf32>
    %215 = arith.divf %213, %214 : vector<16x1xf32>
    %216 = vector.broadcast %215 : vector<16x1xf32> to vector<16x32xf32>
    %217 = arith.subf %211, %216 : vector<16x32xf32>
    %218 = arith.mulf %217, %217 : vector<16x32xf32>
    %cst_69 = arith.constant dense<0.000000e+00> : vector<16xf32>
    %219 = vector.multi_reduction <add>, %218, %cst_69 [1] : vector<16x32xf32> to vector<16xf32>
    %220 = vector.shape_cast %219 : vector<16xf32> to vector<16x1xf32>
    %cst_70 = arith.constant 3.200000e+01 : f32
    %221 = vector.broadcast %cst_70 : f32 to vector<16x1xf32>
    %222 = arith.divf %220, %221 : vector<16x1xf32>
    %cst_71 = arith.constant 9.99999974E-6 : f32
    %223 = vector.broadcast %cst_71 : f32 to vector<16x1xf32>
    %224 = arith.addf %222, %223 : vector<16x1xf32>
    %225 = math.rsqrt %224 : vector<16x1xf32>
    %226 = vector.broadcast %225 : vector<16x1xf32> to vector<16x32xf32>
    %227 = arith.mulf %217, %226 : vector<16x32xf32>
    %228 = vector.broadcast %8 : vector<1x32xf32> to vector<16x32xf32>
    %229 = arith.mulf %227, %228 : vector<16x32xf32>
    %230 = vector.broadcast %10 : vector<1x32xf32> to vector<16x32xf32>
    %231 = arith.addf %229, %230 : vector<16x32xf32>
    %232 = arith.truncf %231 : vector<16x32xf32> to vector<16x32xbf16>
    %c0_72 = arith.constant 0 : index
    %c0_73 = arith.constant 0 : index
    %c0_74 = arith.constant 0 : index
    %233 = vector.load %arg7[%c0_72, %c0_73, %c0_74] : memref<2x32x128xbf16, #tpu.memory_space<vmem>>, vector<1x32x128xbf16>
    %234 = vector.shape_cast %233 : vector<1x32x128xbf16> to vector<32x128xbf16>
    %cst_75 = arith.constant dense<0.000000e+00> : vector<16x128xf32>
    %235 = tpu.matmul %232, %234, %cst_75 {dimension_numbers = #tpu.dot_dimension_numbers<[1], [0], [0], [1], [0, 0, 1, 1], [], []>} : vector<16x32xbf16>, vector<32x128xbf16>, vector<16x128xf32> -> vector<16x128xf32>
    %c0_76 = arith.constant 0 : index
    %c0_77 = arith.constant 0 : index
    %c0_78 = arith.constant 0 : index
    %236 = vector.load %arg8[%c0_76, %c0_77, %c0_78] : memref<2x1x128xf32, #tpu.memory_space<vmem>>, vector<1x1x128xf32>
    %237 = vector.shape_cast %236 : vector<1x1x128xf32> to vector<1x128xf32>
    %238 = vector.broadcast %237 : vector<1x128xf32> to vector<16x128xf32>
    %239 = arith.addf %235, %238 : vector<16x128xf32>
    %cst_79 = arith.constant 5.000000e-01 : f32
    %240 = vector.broadcast %cst_79 : f32 to vector<16x128xf32>
    %241 = arith.mulf %240, %239 : vector<16x128xf32>
    %cst_80 = arith.constant 0.707106769 : f32
    %242 = vector.broadcast %cst_80 : f32 to vector<16x128xf32>
    %243 = arith.mulf %239, %242 : vector<16x128xf32>
    %244 = math.erf %243 : vector<16x128xf32>
    %cst_81 = arith.constant 1.000000e+00 : f32
    %245 = vector.broadcast %cst_81 : f32 to vector<16x128xf32>
    %246 = arith.addf %245, %244 : vector<16x128xf32>
    %247 = arith.mulf %241, %246 : vector<16x128xf32>
    %248 = arith.truncf %247 : vector<16x128xf32> to vector<16x128xbf16>
    %c0_82 = arith.constant 0 : index
    %c0_83 = arith.constant 0 : index
    %c0_84 = arith.constant 0 : index
    %249 = vector.load %arg9[%c0_82, %c0_83, %c0_84] : memref<2x128x32xbf16, #tpu.memory_space<vmem>>, vector<1x128x32xbf16>
    %250 = vector.shape_cast %249 : vector<1x128x32xbf16> to vector<128x32xbf16>
    %cst_85 = arith.constant dense<0.000000e+00> : vector<16x32xf32>
    %251 = tpu.matmul %248, %250, %cst_85 {dimension_numbers = #tpu.dot_dimension_numbers<[1], [0], [0], [1], [0, 0, 1, 1], [], []>} : vector<16x128xbf16>, vector<128x32xbf16>, vector<16x32xf32> -> vector<16x32xf32>
    %252 = vector.broadcast %14 : vector<1x32xf32> to vector<16x32xf32>
    %253 = arith.addf %251, %252 : vector<16x32xf32>
    %254 = arith.addf %211, %253 : vector<16x32xf32>
    %255 = vector.extract_strided_slice %254 {offsets = [0, 0], sizes = [4, 32], strides = [1, 1]} : vector<16x32xf32> to vector<4x32xf32>
    %256 = vector.extract_strided_slice %254 {offsets = [4, 0], sizes = [4, 32], strides = [1, 1]} : vector<16x32xf32> to vector<4x32xf32>
    %257 = vector.extract_strided_slice %254 {offsets = [8, 0], sizes = [4, 32], strides = [1, 1]} : vector<16x32xf32> to vector<4x32xf32>
    %258 = vector.extract_strided_slice %254 {offsets = [12, 0], sizes = [4, 32], strides = [1, 1]} : vector<16x32xf32> to vector<4x32xf32>
    %259 = tpu.concatenate %255, %256, %257, %258 in 1 : vector<4x32xf32>, vector<4x32xf32>, vector<4x32xf32>, vector<4x32xf32> -> vector<4x128xf32>
    %c0_86 = arith.constant 0 : index
    %c0_87 = arith.constant 0 : index
    %260 = vector.load %arg11[%c0_86, %c0_87] : memref<4x128xf32, #tpu.memory_space<vmem>>, vector<4x128xf32>
    tpu.vector_store %arg11[%c0_86, %c0_87], %259 {strides = array<i32>} : memref<4x128xf32, #tpu.memory_space<vmem>>, vector<4x128xf32>,
    %cst_88 = arith.constant dense<0.000000e+00> : vector<32xf32>
    %261 = vector.multi_reduction <add>, %1, %cst_88 [1] : vector<32x32xf32> to vector<32xf32>
    %262 = vector.shape_cast %261 : vector<32xf32> to vector<32x1xf32>
    %cst_89 = arith.constant 3.200000e+01 : f32
    %263 = vector.broadcast %cst_89 : f32 to vector<32x1xf32>
    %264 = arith.divf %262, %263 : vector<32x1xf32>
    %265 = vector.broadcast %264 : vector<32x1xf32> to vector<32x32xf32>
    %266 = arith.subf %1, %265 : vector<32x32xf32>
    %267 = arith.mulf %266, %266 : vector<32x32xf32>
    %cst_90 = arith.constant dense<0.000000e+00> : vector<32xf32>
    %268 = vector.multi_reduction <add>, %267, %cst_90 [1] : vector<32x32xf32> to vector<32xf32>
    %269 = vector.shape_cast %268 : vector<32xf32> to vector<32x1xf32>
    %cst_91 = arith.constant 3.200000e+01 : f32
    %270 = vector.broadcast %cst_91 : f32 to vector<32x1xf32>
    %271 = arith.divf %269, %270 : vector<32x1xf32>
    %cst_92 = arith.constant 9.99999974E-6 : f32
    %272 = vector.broadcast %cst_92 : f32 to vector<32x1xf32>
    %273 = arith.addf %271, %272 : vector<32x1xf32>
    %274 = math.rsqrt %273 : vector<32x1xf32>
    %275 = vector.broadcast %274 : vector<32x1xf32> to vector<32x32xf32>
    %276 = arith.mulf %266, %275 : vector<32x32xf32>
    %277 = vector.broadcast %8 : vector<1x32xf32> to vector<32x32xf32>
    %278 = arith.mulf %276, %277 : vector<32x32xf32>
    %279 = vector.broadcast %10 : vector<1x32xf32> to vector<32x32xf32>
    %280 = arith.addf %278, %279 : vector<32x32xf32>
    %281 = arith.truncf %280 : vector<32x32xf32> to vector<32x32xbf16>
    %c1_93 = arith.constant 1 : index
    %c0_94 = arith.constant 0 : index
    %c0_95 = arith.constant 0 : index
    %282 = vector.load %arg7[%c1_93, %c0_94, %c0_95] : memref<2x32x128xbf16, #tpu.memory_space<vmem>>, vector<1x32x128xbf16>
    %283 = vector.shape_cast %282 : vector<1x32x128xbf16> to vector<32x128xbf16>
    %cst_96 = arith.constant dense<0.000000e+00> : vector<32x128xf32>
    %284 = tpu.matmul %281, %283, %cst_96 {dimension_numbers = #tpu.dot_dimension_numbers<[1], [0], [0], [1], [0, 0, 1, 1], [], []>} : vector<32x32xbf16>, vector<32x128xbf16>, vector<32x128xf32> -> vector<32x128xf32>
    %c1_97 = arith.constant 1 : index
    %c0_98 = arith.constant 0 : index
    %c0_99 = arith.constant 0 : index
    %285 = vector.load %arg8[%c1_97, %c0_98, %c0_99] : memref<2x1x128xf32, #tpu.memory_space<vmem>>, vector<1x1x128xf32>
    %286 = vector.shape_cast %285 : vector<1x1x128xf32> to vector<1x128xf32>
    %287 = vector.broadcast %286 : vector<1x128xf32> to vector<32x128xf32>
    %288 = arith.addf %284, %287 : vector<32x128xf32>
    %cst_100 = arith.constant 5.000000e-01 : f32
    %289 = vector.broadcast %cst_100 : f32 to vector<32x128xf32>
    %290 = arith.mulf %289, %288 : vector<32x128xf32>
    %cst_101 = arith.constant 0.707106769 : f32
    %291 = vector.broadcast %cst_101 : f32 to vector<32x128xf32>
    %292 = arith.mulf %288, %291 : vector<32x128xf32>
    %293 = math.erf %292 : vector<32x128xf32>
    %cst_102 = arith.constant 1.000000e+00 : f32
    %294 = vector.broadcast %cst_102 : f32 to vector<32x128xf32>
    %295 = arith.addf %294, %293 : vector<32x128xf32>
    %296 = arith.mulf %290, %295 : vector<32x128xf32>
    %297 = arith.truncf %296 : vector<32x128xf32> to vector<32x128xbf16>
    %c1_103 = arith.constant 1 : index
    %c0_104 = arith.constant 0 : index
    %c0_105 = arith.constant 0 : index
    %298 = vector.load %arg9[%c1_103, %c0_104, %c0_105] : memref<2x128x32xbf16, #tpu.memory_space<vmem>>, vector<1x128x32xbf16>
    %299 = vector.shape_cast %298 : vector<1x128x32xbf16> to vector<128x32xbf16>
    %cst_106 = arith.constant dense<0.000000e+00> : vector<32x32xf32>
    %300 = tpu.matmul %297, %299, %cst_106 {dimension_numbers = #tpu.dot_dimension_numbers<[1], [0], [0], [1], [0, 0, 1, 1], [], []>} : vector<32x128xbf16>, vector<128x32xbf16>, vector<32x32xf32> -> vector<32x32xf32>
    %301 = vector.broadcast %16 : vector<1x32xf32> to vector<32x32xf32>
    %302 = arith.addf %300, %301 : vector<32x32xf32>
    %303 = arith.addf %1, %302 : vector<32x32xf32>
    %304 = vector.extract_strided_slice %303 {offsets = [0, 0], sizes = [8, 32], strides = [1, 1]} : vector<32x32xf32> to vector<8x32xf32>
    %305 = vector.extract_strided_slice %303 {offsets = [8, 0], sizes = [8, 32], strides = [1, 1]} : vector<32x32xf32> to vector<8x32xf32>
    %306 = vector.extract_strided_slice %303 {offsets = [16, 0], sizes = [8, 32], strides = [1, 1]} : vector<32x32xf32> to vector<8x32xf32>
    %307 = vector.extract_strided_slice %303 {offsets = [24, 0], sizes = [8, 32], strides = [1, 1]} : vector<32x32xf32> to vector<8x32xf32>
    %308 = tpu.concatenate %304, %305, %306, %307 in 1 : vector<8x32xf32>, vector<8x32xf32>, vector<8x32xf32>, vector<8x32xf32> -> vector<8x128xf32>
    %c0_107 = arith.constant 0 : index
    %c0_108 = arith.constant 0 : index
    %309 = vector.load %arg12[%c0_107, %c0_108] : memref<8x128xf32, #tpu.memory_space<vmem>>, vector<8x128xf32>
    tpu.vector_store %arg12[%c0_107, %c0_108], %308 {strides = array<i32>} : memref<8x128xf32, #tpu.memory_space<vmem>>, vector<8x128xf32>,
    return
  }
  func.func @transform_0(%arg0: i32) -> (i32, i32) {
    %c0_i32 = arith.constant 0 : i32
    %c0_i32_0 = arith.constant 0 : i32
    %c0_i32_1 = arith.constant 0 : i32
    return %c0_i32, %c0_i32_0 : i32, i32
  }
  func.func @transform_1(%arg0: i32) -> (i32, i32) {
    %c0_i32 = arith.constant 0 : i32
    %c0_i32_0 = arith.constant 0 : i32
    %c0_i32_1 = arith.constant 0 : i32
    return %c0_i32, %c0_i32_0 : i32, i32
  }
  func.func @transform_2(%arg0: i32) -> (i32, i32) {
    %c0_i32 = arith.constant 0 : i32
    %c0_i32_0 = arith.constant 0 : i32
    %c0_i32_1 = arith.constant 0 : i32
    return %c0_i32, %c0_i32_0 : i32, i32
  }
  func.func @transform_3(%arg0: i32) -> (i32, i32, i32) {
    %c0_i32 = arith.constant 0 : i32
    %c0_i32_0 = arith.constant 0 : i32
    %c0_i32_1 = arith.constant 0 : i32
    %c0_i32_2 = arith.constant 0 : i32
    return %c0_i32, %c0_i32_0, %c0_i32_1 : i32, i32, i32
  }
  func.func @transform_4(%arg0: i32) -> (i32, i32, i32) {
    %c0_i32 = arith.constant 0 : i32
    %c0_i32_0 = arith.constant 0 : i32
    %c0_i32_1 = arith.constant 0 : i32
    %c0_i32_2 = arith.constant 0 : i32
    return %c0_i32, %c0_i32_0, %c0_i32_1 : i32, i32, i32
  }
  func.func @transform_5(%arg0: i32) -> (i32, i32) {
    %c0_i32 = arith.constant 0 : i32
    %c0_i32_0 = arith.constant 0 : i32
    %c0_i32_1 = arith.constant 0 : i32
    return %c0_i32, %c0_i32_0 : i32, i32
  }
  func.func @transform_6(%arg0: i32) -> (i32, i32, i32) {
    %c0_i32 = arith.constant 0 : i32
    %c0_i32_0 = arith.constant 0 : i32
    %c0_i32_1 = arith.constant 0 : i32
    %c0_i32_2 = arith.constant 0 : i32
    return %c0_i32, %c0_i32_0, %c0_i32_1 : i32, i32, i32
  }
  func.func @transform_7(%arg0: i32) -> (i32, i32, i32) {
    %c0_i32 = arith.constant 0 : i32
    %c0_i32_0 = arith.constant 0 : i32
    %c0_i32_1 = arith.constant 0 : i32
    %c0_i32_2 = arith.constant 0 : i32
    return %c0_i32, %c0_i32_0, %c0_i32_1 : i32, i32, i32
  }
  func.func @transform_8(%arg0: i32) -> (i32, i32, i32) {
    %c0_i32 = arith.constant 0 : i32
    %c0_i32_0 = arith.constant 0 : i32
    %c0_i32_1 = arith.constant 0 : i32
    %c0_i32_2 = arith.constant 0 : i32
    return %c0_i32, %c0_i32_0, %c0_i32_1 : i32, i32, i32
  }
  func.func @transform_9(%arg0: i32) -> (i32, i32, i32) {
    %c0_i32 = arith.constant 0 : i32
    %c0_i32_0 = arith.constant 0 : i32
    %c0_i32_1 = arith.constant 0 : i32
    %c0_i32_2 = arith.constant 0 : i32
    return %c0_i32, %c0_i32_0, %c0_i32_1 : i32, i32, i32
  }
  func.func @transform_10(%arg0: i32) -> (i32, i32) {
    %c0_i32 = arith.constant 0 : i32
    %c0_i32_0 = arith.constant 0 : i32
    %c0_i32_1 = arith.constant 0 : i32
    return %c0_i32, %c0_i32_0 : i32, i32
  }
  func.func @transform_11(%arg0: i32) -> (i32, i32) {
    %c0_i32 = arith.constant 0 : i32
    %c0_i32_0 = arith.constant 0 : i32
    %c0_i32_1 = arith.constant 0 : i32
    return %c0_i32, %c0_i32_0 : i32, i32
  }
}

</mosaic_0001>

<bundles_post_ra>
// kernel: tpu_custom_call.1
= control target key start
LH: loop header
LB: loop body
LE: loop exit
PB: predicated region body
PF: predicated region fallthrough
CT: control target
= control target key end

     0   :  { %17 = vsyncpa [#allocation3], 0  ;;  %s3020_s0 = inlined_call_operand.vmem [shape: f32[16,32], index: 0, kind: input, shape index: {}]   ;;  %s3021_s1 = inlined_call_operand.vmem [shape: f32[32,32], index: 1, kind: input, shape index: {}]   ;;  %s3022_s2 = inlined_call_operand.vmem [shape: f32[32,32], index: 2, kind: input, shape index: {}]   ;;  %s3023_s3 = inlined_call_operand.vmem [shape: bf16[3,32,32], index: 3, kind: input, shape index: {}]   ;;  %s3024_s4 = inlined_call_operand.vmem [shape: f32[3,1,32], index: 4, kind: input, shape index: {}]   ;;  %s3025_s5 = inlined_call_operand.hbm [shape: bf16[32,32], index: 5, kind: input, shape index: {}]   ;;  %s3026_s6 = inlined_call_operand.vmem [shape: bf16[2,32,128], index: 6, kind: input, shape index: {}]   ;;  %s3027_s7 = inlined_call_operand.vmem [shape: f32[2,1,128], index: 7, kind: input, shape index: {}]   ;;  %s3028_s8 = inlined_call_operand.vmem [shape: bf16[2,128,32], index: 8, kind: input, shape index: {}]   ;;  %s3029_s9 = inlined_call_operand.hbm [shape: f32[8,1,32], index: 9, kind: input, shape index: {}]   ;;  %s3030_s10 = inlined_call_operand.hbm [shape: f32[4,128], index: 10, kind: output, shape index: {0}]   ;;  %s3031_s11 = inlined_call_operand.hbm [shape: f32[8,128], index: 11, kind: output, shape index: {1}]  }
   0x1   :  { %18 = vsyncpa [#allocation6], 0 }
   0x2   :  { %19 = vsyncpa [#allocation4], 0 }
   0x3   :  { %20 = vsyncpa [#allocation9], 0  ;;  %s35_s19 = sshll.u32 %s3025_s5, 4  ;;  %s2255_s20 = smov [#allocation2]   ;;  %s36_s19 = int_to_ptr.hbm [resolvable:$true] %s35_s19 }
   0x4   :  { %s37_s21 = sshll.u32 %s2255_s20, 4  ;;  %s54_s24 = sshll.u32 %s3029_s9, 4  ;;  %s38_s21 = int_to_ptr.vmem [resolvable:$true] %s37_s21  ;;  %s55_s24 = int_to_ptr.hbm [resolvable:$true] %s54_s24 }
   0x5   :  { %s2256_s25 = smov 64   ;;  %s2257_s26 = smov 4  }
   0x6   :  { %43 = dma.hbm_to_vmem [thread:$0]  %s36_s19, 256, %s38_s21, [#allocation3], %s2256_s25, %s2256_s25, %s2257_s26  }
   0x7   :  { %s2258_s27 = smov [#allocation5]   ;;  %s2259_s29 = smov 16  }
   0x8   :  { %s56_s28 = sshll.u32 %s2258_s27, 4  ;;  %s2260_s30 = smov 1   ;;  %s57_s28 = int_to_ptr.vmem [resolvable:$true] %s56_s28 }
   0x9   :  { %62 = dma.hbm_to_vmem [thread:$0]  %s55_s24, 128, %s57_s28, [#allocation6], %s2259_s29, %s2259_s29, %s2260_s30  }
   0xa   :  { %2247 = dma.done.wait [#allocation3], 256  }
   0xb   :  { %2248 = vsyncadd [#allocation3], 4294967040 }
   0xc   :  { %2249 = dma.done.wait [#allocation6], 128  }
   0xd   :  { %2250 = vsyncadd [#allocation6], 4294967168  ;;  %vm95_vm0 = vcmask 261120   ;;  %v74_v0 = vld [vmem:[%s3021_s1] sm:$0xff]  ;;  %v75_v4 = vld [vmem:[%s3021_s1 + $0x8] sm:$0xff]  ;;  %v2261_v8 = vmov 32.0  }
   0xe   :  { %v72_v1 = vld [vmem:[%s3020_s0] sm:$0xff]  ;;  %v157_v2 = vsel %vm95_vm0, %v74_v0, 0.0  ;;  %v73_v5 = vld [vmem:[%s3020_s0 + $0x8] sm:$0xff]  ;;  %v160_v6 = vsel %vm95_vm0, %v75_v4, 0.0  ;;  %2073 = vrcp.f32 %v2261_v8  ;;  %v77_v31 = vld [vmem:[%s3021_s1 + $0x18] sm:$0xff]  ;;  %s2262_s17 = smov 104  }
   0xf   :  { %v96_v3 = vsel %vm95_vm0, %v72_v1, 0.0  ;;  %158 = vadd.xlane.f32.xlu1 %v157_v2  ;;  %v99_v7 = vsel %vm95_vm0, %v73_v5, 0.0  ;;  %v166_v34 = vsel %vm95_vm0, %v77_v31, 0.0  ;;  %v76_v37 = vld [vmem:[%s3021_s1 + $0x10] sm:$0xff]  ;;  %v2394_v39 = vld [vmem:[%s3022_s2] sm:$0xff]  ;;  %v1988_v41 = vld [vmem:[%s3023_s3 + $0x8] sm:$0xff] }
  0x10   :  { %97 = vadd.xlane.f32.xlu0 %v96_v3  ;;  %v163_v38 = vsel %vm95_vm0, %v76_v37, 0.0  ;;  %v253_v40 = vsel %vm95_vm0, %v2394_v39, 0.0  ;;  %383 = vmatpush.bf16.msra.mxu1 %v1988_v41  ;;  %v1987_v48 = vld [vmem:[%s3023_s3] sm:$0xff]  ;;  %v1990_v51 = vld [vmem:[%s3023_s3 + $0x18] sm:$0xff]  ;;  %v1989_v56 = vld [vmem:[%s3023_s3 + $0x10] sm:$0xff]  ;;  %s2263_s18 = smov 120  }
  0x11   :  { %v2449_v41 = vld [vmem:[#allocation5] ss:$0 sm:$0xff]  ;;  %s2264_s21 = smov 112   ;;  %s2266_s9 = smov 8  }
  0x12   :  { %s2267_s16 = smov 32   ;;  %s1780_s23 = sshll.u32 %s3031_s11, 4  ;;  %s1781_s23 = int_to_ptr.hbm [resolvable:$true] %s1780_s23 }
  0x14   :  { %v2074_v9 = vpop.eup %2073  ;;  %384 = vmatpush.bf16.msra.mxu1 %v1987_v48 }
  0x15   :  { %v103_v10 = vmul.f32 32.0, %v2074_v9  ;;  %vm107_vm1 = vweird.f32 %v2074_v9 }
  0x17   :  { %161 = vadd.xlane.f32.xlu1 %v160_v6  ;;  %v104_v11 = vsub.f32 1.0, %v103_v10 }
  0x18   :  { %100 = vadd.xlane.f32.xlu0 %v99_v7  ;;  %425 = vmatpush.bf16.msrb.mxu1 %v1990_v51 }
  0x19   :  { %v105_v12 = vmul.f32 %v2074_v9, %v104_v11 }
  0x1b   :  { %v106_v13 = vadd.f32 %v2074_v9, %v105_v12 }
  0x1c   :  { %426 = vmatpush.bf16.msrb.mxu1 %v1989_v56 }
  0x1d   :  { %v2357_v14 = vsel %vm107_vm1, %v2074_v9, %v106_v13 }
  0x82   :  { %v159_v15 = vpop.xlane.xlu1 %158 }
  0x83   :  { %v98_v16 = vpop.xlane.xlu0 %97  ;;  %v169_v17 = vmul.f32 %v159_v15, %v2357_v14 }
  0x84   :  { %v109_v18 = vmul.f32 %v2357_v14, %v98_v16 }
  0x85   :  { %v2361_v19 = vsub.f32 %v74_v0, %v169_v17 }
  0x86   :  { %v2363_v20 = vsub.f32 %v72_v1, %v109_v18 }
  0x87   :  { %v177_v21 = vmul.f32 %v2361_v19, %v2361_v19 }
  0x88   :  { %v113_v22 = vmul.f32 %v2363_v20, %v2363_v20 }
  0x89   :  { %v181_v23 = vsel %vm95_vm0, %v177_v21, 0.0 }
  0x8a   :  { %v115_v24 = vsel %vm95_vm0, %v113_v22, 0.0  ;;  %v162_v25 = vpop.xlane.xlu1 %161  ;;  %182 = vadd.xlane.f32.xlu0 %v181_v23 }
  0x8b   :  { %116 = vadd.xlane.f32.xlu2 %v115_v24  ;;  %v101_v26 = vpop.xlane.xlu0 %100  ;;  %v170_v27 = vmul.f32 %v162_v25, %v2357_v14 }
  0x8c   :  { %v110_v28 = vmul.f32 %v2357_v14, %v101_v26 }
  0x8d   :  { %v2373_v29 = vsub.f32 %v75_v4, %v170_v27 }
  0x8e   :  { %v2375_v30 = vsub.f32 %v73_v5, %v110_v28  ;;  %v2439_v28 = vld [vmem:[%s3022_s2 + $0x8] sm:$0xff] }
  0x8f   :  { %v178_v32 = vmul.f32 %v2373_v29, %v2373_v29 }
  0x90   :  { %v114_v33 = vmul.f32 %v2375_v30, %v2375_v30 }
  0x91   :  { %v184_v35 = vsel %vm95_vm0, %v178_v32, 0.0 }
  0x92   :  { %v118_v36 = vsel %vm95_vm0, %v114_v33, 0.0  ;;  %185 = vadd.xlane.f32.xlu1 %v184_v35  ;;  %167 = vadd.xlane.f32.xlu0 %v166_v34  ;;  %v256_v33 = vsel %vm95_vm0, %v2439_v28, 0.0  ;;  %v2445_v35 = vld [vmem:[#allocation5 + $0x2] ss:$0 sm:$0xff] }
  0x93   :  { %119 = vadd.xlane.f32.xlu2 %v118_v36 }
  0x9a   :  { %254 = vadd.xlane.f32.xlu1 %v253_v40 }
  0x9b   :  { %164 = vadd.xlane.f32.xlu2 %v163_v38 }
  0xa3   :  { %257 = vadd.xlane.f32.xlu2 %v256_v33 }
  0xfd   :  { %v183_v43 = vpop.xlane.xlu0 %182 }
  0xfe   :  { %v117_v42 = vpop.xlane.xlu2 %116  ;;  %v193_v45 = vmul.f32 %v183_v43, %v2357_v14 }
  0xff   :  { %v121_v44 = vmul.f32 %v117_v42, %v2357_v14 }
 0x100   :  { %v197_v47 = vadd.f32 1e-05, %v193_v45 }
 0x101   :  { %v123_v46 = vadd.f32 1e-05, %v121_v44  ;;  %v2451_v44 = vld [vmem:[#allocation5 + $0x3] ss:$0 sm:$0xff] }
 0x102   :  { %vm207_vm2 = vweird.f32 %v197_v47 }
 0x103   :  { %2075 = vrsqrt.f32 %v123_v46  ;;  %vm131_vm6 = vweird.f32 %v123_v46 }
 0x104   :  { %2077 = vrsqrt.f32 %v197_v47 }
 0x105   :  { %v186_v49 = vpop.xlane.xlu1 %185  ;;  %v168_v54 = vpop.xlane.xlu0 %167 }
 0x106   :  { %v120_v50 = vpop.xlane.xlu2 %119  ;;  %v194_v52 = vmul.f32 %v186_v49, %v2357_v14  ;;  %v172_v55 = vmul.f32 %v168_v54, %v2357_v14  ;;  %v2457_v49 = vld [vmem:[#allocation5 + $0x1] ss:$0 sm:$0xff] }
 0x107   :  { %v122_v53 = vmul.f32 %v120_v50, %v2357_v14 }
 0x108   :  { %v198_v58 = vadd.f32 1e-05, %v194_v52  ;;  %v2415_v62 = vsub.f32 %v77_v31, %v172_v55 }
 0x109   :  { %v2076_v57 = vpop.eup %2075  ;;  %v124_v59 = vadd.f32 1e-05, %v122_v53 }
 0x10a   :  { %v2078_v60 = vpop.eup %2077  ;;  %v126_v61 = vmul.f32 %v2076_v57, %v123_v46  ;;  %2079 = vrsqrt.f32 %v198_v58  ;;  %v180_v1 = vmul.f32 %v2415_v62, %v2415_v62  ;;  %vm132_vm4 = vweird.f32 %v2076_v57 }
 0x10b   :  { %v202_v63 = vmul.f32 %v2078_v60, %v197_v47  ;;  %2081 = vrsqrt.f32 %v124_v59  ;;  %vm208_vm3 = vweird.f32 %v2078_v60  ;;  %vm2430_vm7 = vmor %vm131_vm6, %vm132_vm4  ;;  %vm217_vm8 = vweird.f32 %v198_v58 }
 0x10c   :  { %v127_v0 = vmul.f32 %v2076_v57, %v126_v61  ;;  %v190_v5 = vsel %vm95_vm0, %v180_v1, 0.0  ;;  %vm2423_vm5 = vmor %vm207_vm2, %vm208_vm3  ;;  %vm141_vm12 = vweird.f32 %v124_v59  ;;  %vm635_vm6 = vcmask 130048  }
 0x10d   :  { %v203_v2 = vmul.f32 %v2078_v60, %v202_v63  ;;  %191 = vadd.xlane.f32.xlu1 %v190_v5 }
 0x10e   :  { %v128_v3 = vmul.f32 0.5, %v127_v0  ;;  %v165_v4 = vpop.xlane.xlu2 %164 }
 0x10f   :  { %v204_v6 = vmul.f32 0.5, %v203_v2  ;;  %v171_v7 = vmul.f32 %v165_v4, %v2357_v14 }
 0x110   :  { %v129_v8 = vsub.f32 1.5, %v128_v3  ;;  %v2080_v9 = vpop.eup %2079 }
 0x111   :  { %v205_v10 = vsub.f32 1.5, %v204_v6  ;;  %v2421_v11 = vsub.f32 %v76_v37, %v171_v7  ;;  %v2082_v12 = vpop.eup %2081  ;;  %v212_v13 = vmul.f32 %v2080_v9, %v198_v58  ;;  %vm218_vm9 = vweird.f32 %v2080_v9 }
 0x112   :  { %v130_v15 = vmul.f32 %v2076_v57, %v129_v8  ;;  %v136_v18 = vmul.f32 %v2082_v12, %v124_v59  ;;  %vm219_vm10 = vmor %vm217_vm8, %vm218_vm9  ;;  %vm142_vm11 = vweird.f32 %v2082_v12 }
 0x113   :  { %v206_v16 = vmul.f32 %v2078_v60, %v205_v10  ;;  %v179_v21 = vmul.f32 %v2421_v11, %v2421_v11  ;;  %v213_v22 = vmul.f32 %v2080_v9, %v212_v13  ;;  %vm143_vm13 = vmor %vm141_vm12, %vm142_vm11 }
 0x114   :  { %v137_v23 = vmul.f32 %v2082_v12, %v136_v18  ;;  %v134_v31 = vsel %vm2430_vm7, %v2076_v57, %v130_v15 }
 0x115   :  { %v187_v24 = vsel %vm95_vm0, %v179_v21, 0.0  ;;  %v210_v26 = vsel %vm2423_vm5, %v2078_v60, %v206_v16  ;;  %v214_v27 = vmul.f32 0.5, %v213_v22  ;;  %v145_v38 = vmul.f32 %v134_v31, %v2363_v20  ;;  %v2477_v60 = vpop.xlane.xlu1 %254 }
 0x116   :  { %188 = vadd.xlane.f32.xlu0 %v187_v24  ;;  %v138_v32 = vmul.f32 0.5, %v137_v23  ;;  %v241_v36 = vmul.f32 %v210_v26, %v2361_v19  ;;  %v2065_v26 = vld [vmem:[%s3024_s4] ss:$0 sm:$0xff]  ;;  %vm530_vm5 = vcmask 64512  }
 0x117   :  { %v215_v34 = vsub.f32 1.5, %v214_v27  ;;  %v150_v48 = vmul.f32 %v2449_v41, %v145_v38 }
 0x118   :  { %v139_v37 = vsub.f32 1.5, %v138_v32  ;;  %v1420_v45 = vmul.f32 %v2445_v35, %v241_v36  ;;  %v245_v56 = vmul.f32 %v2449_v41, %v241_v36 }
 0x119   :  { %v216_v40 = vmul.f32 %v2080_v9, %v215_v34  ;;  %v155_v53 = vadd.f32 %v2457_v49, %v150_v48 }
 0x11a   :  { %v140_v42 = vmul.f32 %v2082_v12, %v139_v37  ;;  %v2462_v51 = vadd.f32 %v2451_v44, %v1420_v45  ;;  %v249_v58 = vadd.f32 %v2457_v49, %v245_v56 }
 0x11b   :  { %v220_v43 = vsel %vm219_vm10, %v2080_v9, %v216_v40 }
 0x11c   :  { %v242_v46 = vmul.f32 %v220_v43, %v2373_v29  ;;  %v144_v47 = vsel %vm143_vm13, %v2082_v12, %v140_v42  ;;  %v2508_v42 = vld [vmem:[%s3024_s4 + $0x1] ss:$0 sm:$0xff] }
 0x11d   :  { %v146_v19 = vmul.f32 %v144_v47, %v2375_v30  ;;  %v265_v47 = vmul.f32 %v2477_v60, %v2357_v14 }
 0x11e   :  { %v1421_v20 = vmul.f32 %v2445_v35, %v242_v46  ;;  %v246_v55 = vmul.f32 %v2449_v41, %v242_v46 }
 0x11f   :  { %v151_v50 = vmul.f32 %v2449_v41, %v146_v19  ;;  %v258_v19 = vpop.xlane.xlu2 %257  ;;  %v2525_v48 = vsub.f32 %v2394_v39, %v265_v47  ;;  %v2540_v39 = vld [vmem:[%s3022_s2 + $0x10] sm:$0xff] }
 0x120   :  { %v2465_v52 = vadd.f32 %v2451_v44, %v1421_v20  ;;  %v250_v57 = vadd.f32 %v2457_v49, %v246_v55  ;;  %v266_v20 = vmul.f32 %v258_v19, %v2357_v14  ;;  %v259_v56 = vsel %vm95_vm0, %v2540_v39, 0.0 }
 0x121   :  { %v156_v29 = vadd.f32 %v2457_v49, %v151_v50  ;;  %v273_v50 = vmul.f32 %v2525_v48, %v2525_v48 }
 0x122   :  { %v1428_v30 = vpack.c.bf16 %v2465_v52, %v2462_v51  ;;  %v391_v59 = vpack.c.bf16 %v250_v57, %v249_v58  ;;  %v2548_v58 = vld [vmem:[%s3022_s2 + $0x18] sm:$0xff] }
 0x123   :  { %v354_v54 = vpack.c.bf16 %v156_v29, %v155_v53  ;;  %v2531_v53 = vsub.f32 %v2439_v28, %v266_v20  ;;  %v277_v29 = vsel %vm95_vm0, %v273_v50, 0.0 }
 0x125   :  { %1806 = vmatmul.msk.bf16.vlgmr.msra.gmra.mxu1 %vm95_vm0, %v354_v54  ;;  %v274_v54 = vmul.f32 %v2531_v53, %v2531_v53 }
 0x127   :  { %v280_v55 = vsel %vm95_vm0, %v274_v54, 0.0 }
 0x135   :  { %1819 = vmatmul.msk.bf16.vlgmr.msrb.gmra.mxu1 %vm95_vm0, %v391_v59  ;;  %v262_v59 = vsel %vm95_vm0, %v2548_v58, 0.0 }
 0x180   :  { %v192_v61 = vpop.xlane.xlu1 %191 }
 0x181   :  { %v196_v63 = vmul.f32 %v192_v61, %v2357_v14 }
 0x183   :  { %v200_v0 = vadd.f32 1e-05, %v196_v63 }
 0x185   :  { %2083 = vrsqrt.f32 %v200_v0  ;;  %vm237_vm14 = vweird.f32 %v200_v0 }
 0x189   :  { %v189_v1 = vpop.xlane.xlu0 %188 }
 0x18a   :  { %v195_v2 = vmul.f32 %v189_v1, %v2357_v14 }
 0x18b   :  { %v2084_v4 = vpop.eup %2083 }
 0x18c   :  { %v199_v3 = vadd.f32 1e-05, %v195_v2  ;;  %v232_v5 = vmul.f32 %v2084_v4, %v200_v0  ;;  %vm238_vm15 = vweird.f32 %v2084_v4 }
 0x18d   :  { %vm239_vm1 = vmor %vm237_vm14, %vm238_vm15 }
 0x18e   :  { %2085 = vrsqrt.f32 %v199_v3  ;;  %v233_v6 = vmul.f32 %v2084_v4, %v232_v5  ;;  %vm227_vm2 = vweird.f32 %v199_v3 }
 0x190   :  { %v234_v7 = vmul.f32 0.5, %v233_v6 }
 0x192   :  { %v235_v9 = vsub.f32 1.5, %v234_v7 }
 0x194   :  { %v2086_v8 = vpop.eup %2085  ;;  %v236_v12 = vmul.f32 %v2084_v4, %v235_v9  ;;  %v1992_v9 = vld [vmem:[%s3023_s3 + $0x28] sm:$0xff] }
 0x195   :  { %v222_v10 = vmul.f32 %v2086_v8, %v199_v3  ;;  %vm228_vm3 = vweird.f32 %v2086_v8  ;;  %472 = vmatpush.bf16.msra.mxu2 %v1992_v9 }
 0x196   :  { %v240_v15 = vsel %vm239_vm1, %v2084_v4, %v236_v12  ;;  %vm229_vm4 = vmor %vm227_vm2, %vm228_vm3 }
 0x197   :  { %v223_v13 = vmul.f32 %v2086_v8, %v222_v10  ;;  %v244_v17 = vmul.f32 %v240_v15, %v2415_v62  ;;  %v1991_v10 = vld [vmem:[%s3023_s3 + $0x20] sm:$0xff] }
 0x199   :  { %v224_v16 = vmul.f32 0.5, %v223_v13  ;;  %v248_v22 = vmul.f32 %v2449_v41, %v244_v17  ;;  %v1423_v23 = vmul.f32 %v2445_v35, %v244_v17  ;;  %473 = vmatpush.bf16.msra.mxu2 %v1991_v10 }
 0x19b   :  { %v225_v18 = vsub.f32 1.5, %v224_v16  ;;  %v252_v31 = vadd.f32 %v2457_v49, %v248_v22  ;;  %v2492_v32 = vadd.f32 %v2451_v44, %v1423_v23 }
 0x19d   :  { %v226_v21 = vmul.f32 %v2086_v8, %v225_v18 }
 0x19f   :  { %v230_v24 = vsel %vm229_vm4, %v2086_v8, %v226_v21  ;;  %vm786_vm4 = vcmask 195584  }
 0x1a0   :  { %v243_v25 = vmul.f32 %v230_v24, %v2421_v11 }
 0x1a2   :  { %v247_v27 = vmul.f32 %v2449_v41, %v243_v25  ;;  %v1422_v62 = vmul.f32 %v2445_v35, %v243_v25  ;;  %v386_v33 = vpop.f32.mrf.mxu1 }
 0x1a3   :  { %v387_v34 = vadd.f32 %v2065_v26, %v386_v33 }
 0x1a4   :  { %v251_v36 = vadd.f32 %v2457_v49, %v247_v27  ;;  %v2496_v37 = vadd.f32 %v2451_v44, %v1422_v62 }
 0x1a5   :  { %494 = vrot.lane.b32.xlu2 %v387_v34, %s2262_s17  ;;  %490 = vrot.lane.b32.xlu1 %v387_v34, %s2263_s18 }
 0x1a6   :  { %v392_v11 = vpack.c.bf16 %v252_v31, %v251_v36  ;;  %v1429_v35 = vpack.c.bf16 %v2492_v32, %v2496_v37 }
 0x1a8   :  { %1820 = vmatmul.msk.bf16.gmra.mxu1 %vm95_vm0, %v392_v11 }
 0x1aa   :  { %v388_v38 = vpop.f32.mrf.mxu1 }
 0x1ab   :  { %v2503_v40 = vadd.f32 %v2065_v26, %v388_v38 }
 0x1b2   :  { %v428_v43 = vpop.f32.mrf.mxu1 }
 0x1b3   :  { %v429_v44 = vadd.f32 %v2508_v42, %v428_v43 }
 0x1b5   :  { %498 = vrot.lane.b32.xlu0 %v429_v44, %s2263_s18  ;;  %502 = vrot.lane.b32.xlu1 %v429_v44, %s2264_s21 }
 0x1ba   :  { %v430_v45 = vpop.f32.mrf.mxu1 }
 0x1bb   :  { %v431_v46 = vadd.f32 %v2508_v42, %v430_v45 }
 0x1bd   :  { %500 = vrot.lane.b32.xlu2 %v431_v46, %s2263_s18  ;;  %1835 = vmatpush.xpose.msk.msra.mxu3 %vm530_vm5, %v431_v46 }
 0x1be   :  { %506 = vrot.lane.b32.xlu0 %v429_v44, %s2262_s17  ;;  %504 = vrot.lane.b32.xlu1 %v431_v46, %s2264_s21 }
 0x1c1   :  { %1836 = vmatpush.xpose.msk.msra.mxu3 %vm530_vm5, %v429_v44 }
 0x1c4   :  { %1837 = vmatmul.msk.f32.vlgmr.msra.gmra.mxu3 %vm530_vm5, %v387_v34 }
 0x1c5   :  { %508 = vrot.lane.b32.xlu2 %v431_v46, %s2262_s17 }
 0x1c6   :  { %492 = vrot.lane.b32.xlu1 %v387_v34, %s2264_s21 }
 0x1e8   :  { %278 = vadd.xlane.f32.xlu0 %v277_v29 }
 0x1ee   :  { %281 = vadd.xlane.f32.xlu2 %v280_v55  ;;  %v2591_v55 = vld [vmem:[%s3024_s4 + $0x2] ss:$0 sm:$0xff]  ;;  %s2265_s4 = smov 24  }
 0x1f0   :  { %263 = vadd.xlane.f32.xlu0 %v262_v59 }
 0x1f6   :  { %260 = vadd.xlane.f32.xlu2 %v259_v56 }
 0x1ff   :  { %v495_v28 = vpop.permute.xlu2 %494 }
 0x217   :  { %v501_v57 = vpop.permute.xlu2 %500  ;;  %v491_v60 = vpop.permute.xlu1 %490 }
 0x218   :  { %1838 = vmatpush.xpose.msk.msrb.mxu3 %vm530_vm5, %v501_v57 }
 0x21f   :  { %v509_v1 = vpop.permute.xlu2 %508 }
 0x225   :  { %v2552_v61 = vpop.f32.mrf.mxu1 }
 0x227   :  { %v503_v63 = vpop.permute.xlu1 %502  ;;  %v499_v0 = vpop.permute.xlu0 %498 }
 0x228   :  { %1839 = vmatpush.xpose.msk.msrb.mxu3 %vm530_vm5, %v499_v0 }
 0x22b   :  { %1840 = vmatmul.msk.f32.vlgmr.msrb.gmra.mxu3 %vm530_vm5, %v491_v60  ;;  %v434_v60 = vadd.f32 %v2508_v42, %v2552_v61 }
 0x22c   :  { %1844 = vmatpush.xpose.msk.msra.mxu3 %vm530_vm5, %v509_v1 }
 0x22d   :  { %v435_v2 = vpop.f32.mrf.mxu1 }
 0x22e   :  { %v2558_v3 = vadd.f32 %v2508_v42, %v435_v2 }
 0x230   :  { %836 = vrot.lane.b32.xlu2 %v2558_v3, %s2262_s17  ;;  %v505_v4 = vpop.permute.xlu1 %504  ;;  %v507_v5 = vpop.permute.xlu0 %506 }
 0x231   :  { %1841 = vmatpush.xpose.msk.msra.mxu1 %vm530_vm5, %v505_v4  ;;  %1845 = vmatpush.xpose.msk.msra.mxu3 %vm530_vm5, %v507_v5 }
 0x234   :  { %1846 = vmatmul.msk.f32.vlgmr.msra.gmra.mxu3 %vm530_vm5, %v495_v28 }
 0x235   :  { %1842 = vmatpush.xpose.msk.msra.mxu1 %vm530_vm5, %v503_v63 }
 0x238   :  { %v493_v6 = vpop.permute.xlu1 %492 }
 0x239   :  { %1843 = vmatmul.msk.f32.vlgmr.msra.gmra.mxu1 %vm530_vm5, %v493_v6 }
 0x247   :  { %v2567_v7 = vpop.f32.mrf.mxu3 }
 0x248   :  { %v636_v8 = vsel %vm635_vm6, %v2567_v7, -inf }
 0x249   :  { %637 = vmax.xlane.f32.xlu0 %v636_v8 }
 0x25b   :  { %v279_v12 = vpop.xlane.xlu0 %278 }
 0x25c   :  { %v289_v13 = vmul.f32 %v279_v12, %v2357_v14 }
 0x25e   :  { %v293_v15 = vadd.f32 1e-05, %v289_v13 }
 0x260   :  { %2087 = vrsqrt.f32 %v293_v15  ;;  %vm303_vm7 = vweird.f32 %v293_v15 }
 0x261   :  { %v282_v16 = vpop.xlane.xlu2 %281 }
 0x262   :  { %v290_v17 = vmul.f32 %v282_v16, %v2357_v14 }
 0x263   :  { %v264_v63 = vpop.xlane.xlu0 %263 }
 0x264   :  { %v294_v18 = vadd.f32 1e-05, %v290_v17  ;;  %v268_v12 = vmul.f32 %v264_v63, %v2357_v14 }
 0x266   :  { %v2088_v21 = vpop.eup %2087  ;;  %2089 = vrsqrt.f32 %v294_v18  ;;  %vm313_vm11 = vweird.f32 %v294_v18  ;;  %v2616_v13 = vsub.f32 %v2548_v58, %v268_v12 }
 0x267   :  { %v298_v22 = vmul.f32 %v2088_v21, %v293_v15  ;;  %vm304_vm8 = vweird.f32 %v2088_v21 }
 0x268   :  { %vm305_vm9 = vmor %vm303_vm7, %vm304_vm8  ;;  %v276_v15 = vmul.f32 %v2616_v13, %v2616_v13 }
 0x269   :  { %v299_v23 = vmul.f32 %v2088_v21, %v298_v22  ;;  %v261_v16 = vpop.xlane.xlu2 %260 }
 0x26a   :  { %v286_v17 = vsel %vm95_vm0, %v276_v15, 0.0 }
 0x26b   :  { %v300_v24 = vmul.f32 0.5, %v299_v23 }
 0x26c   :  { %v2090_v25 = vpop.eup %2089 }
 0x26d   :  { %v301_v26 = vsub.f32 1.5, %v300_v24  ;;  %v308_v27 = vmul.f32 %v2090_v25, %v294_v18  ;;  %vm314_vm10 = vweird.f32 %v2090_v25 }
 0x26e   :  { %vm315_vm12 = vmor %vm313_vm11, %vm314_vm10 }
 0x26f   :  { %v302_v31 = vmul.f32 %v2088_v21, %v301_v26  ;;  %v309_v62 = vmul.f32 %v2090_v25, %v308_v27 }
 0x271   :  { %v306_v33 = vsel %vm305_vm9, %v2088_v21, %v302_v31  ;;  %v310_v34 = vmul.f32 0.5, %v309_v62  ;;  %v267_v31 = vmul.f32 %v261_v16, %v2357_v14 }
 0x272   :  { %v337_v11 = vmul.f32 %v306_v33, %v2525_v48 }
 0x273   :  { %v311_v36 = vsub.f32 1.5, %v310_v34  ;;  %v2630_v62 = vsub.f32 %v2540_v39, %v267_v31 }
 0x274   :  { %v341_v45 = vmul.f32 %v2449_v41, %v337_v11 }
 0x275   :  { %v312_v38 = vmul.f32 %v2090_v25, %v311_v36  ;;  %v275_v11 = vmul.f32 %v2630_v62, %v2630_v62 }
 0x276   :  { %v345_v47 = vadd.f32 %v2457_v49, %v341_v45 }
 0x277   :  { %v316_v43 = vsel %vm315_vm12, %v2090_v25, %v312_v38  ;;  %v283_v45 = vsel %vm95_vm0, %v275_v11, 0.0 }
 0x278   :  { %v338_v44 = vmul.f32 %v316_v43, %v2531_v53 }
 0x27a   :  { %v342_v46 = vmul.f32 %v2449_v41, %v338_v44 }
 0x27c   :  { %v346_v19 = vadd.f32 %v2457_v49, %v342_v46 }
 0x27e   :  { %v438_v20 = vpack.c.bf16 %v346_v19, %v345_v47 }
 0x280   :  { %1833 = vmatmul.msk.bf16.vlgmr.msra.gmra.mxu2 %vm95_vm0, %v438_v20 }
 0x28a   :  { %v2625_v18 = vpop.permute.xlu2 %836 }
 0x2ae   :  { %v580_v50 = vpop.f32.mrf.mxu3 }
 0x2af   :  { %v639_v48 = vsel %vm635_vm6, %v580_v50, -inf }
 0x2b0   :  { %640 = vmax.xlane.f32.xlu1 %v639_v48 }
 0x2b6   :  { %v606_v29 = vpop.f32.mrf.mxu1 }
 0x2b7   :  { %v642_v54 = vsel %vm635_vm6, %v606_v29, -inf  ;;  %v632_v4 = vpop.f32.mrf.mxu3 }
 0x2b8   :  { %643 = vmax.xlane.f32.xlu0 %v642_v54  ;;  %v645_v61 = vsel %vm635_vm6, %v632_v4, -inf }
 0x2bc   :  { %v638_v0 = vpop.xlane.xlu0 %637 }
 0x2bd   :  { %v648_v1 = vsub.f32 %v2567_v7, %v638_v0 }
 0x2bf   :  { %v652_v2 = vmul.f32 1.442695, %v648_v1 }
 0x2c1   :  { %2091 = vpow2.f32 %v652_v2 }
 0x2c7   :  { %v2092_v8 = vpop.eup %2091 }
 0x2c8   :  { %v660_v9 = vsel %vm635_vm6, %v2092_v8, 0.0 }
 0x303   :  { %v475_v53 = vpop.f32.mrf.mxu2 }
 0x304   :  { %v476_v28 = vadd.f32 %v2591_v55, %v475_v53 }
 0x30b   :  { %v477_v56 = vpop.f32.mrf.mxu2 }
 0x30c   :  { %v478_v57 = vadd.f32 %v2591_v55, %v477_v56 }
 0x30e   :  { %697 = vmatpush.msra.mxu0 %v478_v57  ;;  %v2041_v59 = vpack.i.bf16 %v476_v28, %v478_v57 }
 0x310   :  { %2042 = vrot.lane.b32.xlu2 %v2041_v59, %s2264_s21  ;;  %2037 = vrot.lane.b32.xlu0 %v2041_v59, %s2262_s17 }
 0x311   :  { %2032 = vrot.lane.b32.xlu1 %v2041_v59, %s2263_s18  ;;  %698 = vmatpush.msra.mxu0 %v476_v28 }
 0x318   :  { %822 = vrot.lane.b32.xlu0 %v2503_v40, %s2262_s17 }
 0x319   :  { %834 = vrot.lane.b32.xlu1 %v434_v60, %s2262_s17 }
 0x321   :  { %832 = vrot.lane.b32.xlu1 %v2558_v3, %s2264_s21 }
 0x323   :  { %v641_v21 = vpop.xlane.xlu1 %640 }
 0x324   :  { %v649_v22 = vsub.f32 %v580_v50, %v641_v21 }
 0x326   :  { %v654_v24 = vmul.f32 1.442695, %v649_v22 }
 0x329   :  { %830 = vrot.lane.b32.xlu1 %v434_v60, %s2264_s21 }
 0x32b   :  { %v644_v5 = vpop.xlane.xlu0 %643 }
 0x32c   :  { %v650_v42 = vsub.f32 %v606_v29, %v644_v5 }
 0x32e   :  { %v656_v6 = vmul.f32 1.442695, %v650_v42 }
 0x330   :  { %2093 = vpow2.f32 %v656_v6 }
 0x331   :  { %826 = vrot.lane.b32.xlu1 %v434_v60, %s2263_s18  ;;  %2095 = vpow2.f32 %v654_v24 }
 0x336   :  { %v2610_v10 = vpop.eup %2093 }
 0x337   :  { %v666_v7 = vsel %vm635_vm6, %v2610_v10, 0.0  ;;  %v2096_v26 = vpop.eup %2095 }
 0x338   :  { %v663_v27 = vsel %vm635_vm6, %v2096_v26, 0.0 }
 0x339   :  { %646 = vmax.xlane.f32.xlu2 %v645_v61 }
 0x342   :  { %661 = vadd.xlane.f32.xlu0 %v660_v9 }
 0x34a   :  { %667 = vadd.xlane.f32.xlu0 %v666_v7 }
 0x351   :  { %828 = vrot.lane.b32.xlu2 %v2558_v3, %s2263_s18 }
 0x35b   :  { %287 = vadd.xlane.f32.xlu1 %v286_v17 }
 0x35e   :  { %820 = vrot.lane.b32.xlu0 %v2503_v40, %s2264_s21 }
 0x36a   :  { %v2043_v23 = vpop.permute.xlu2 %2042 }
 0x36b   :  { %v2044_v58 = vunpack.i.l.bf16 %v2043_v23  ;;  %v2045_v25 = vunpack.i.h.bf16 %v2043_v23 }
 0x36d   :  { %743 = vmatpush.msrb.mxu0 %v2044_v58 }
 0x36f   :  { %744 = vmatpush.msrb.mxu0 %v2045_v25 }
 0x37a   :  { %664 = vadd.xlane.f32.xlu2 %v663_v27 }
 0x382   :  { %v2038_v33 = vpop.permute.xlu0 %2037 }
 0x383   :  { %v2033_v34 = vpop.permute.xlu1 %2032  ;;  %v2039_v36 = vunpack.i.l.bf16 %v2038_v33  ;;  %v2040_v43 = vunpack.i.h.bf16 %v2038_v33 }
 0x384   :  { %v2034_v38 = vunpack.i.l.bf16 %v2033_v34  ;;  %v2035_v44 = vunpack.i.h.bf16 %v2033_v34 }
 0x385   :  { %766 = vmatpush.msrb.mxu1 %v2039_v36 }
 0x386   :  { %720 = vmatpush.msrb.mxu3 %v2034_v38 }
 0x387   :  { %767 = vmatpush.msrb.mxu1 %v2040_v43 }
 0x388   :  { %721 = vmatpush.msrb.mxu3 %v2035_v44  ;;  %284 = vadd.xlane.f32.xlu0 %v283_v45 }
 0x38a   :  { %1860 = vmatpush.xpose.msk.msra.mxu3 %vm530_vm5, %v2558_v3  ;;  %v823_v20 = vpop.permute.xlu0 %822 }
 0x38b   :  { %v835_v39 = vpop.permute.xlu1 %834 }
 0x38e   :  { %1861 = vmatpush.xpose.msk.msra.mxu3 %vm530_vm5, %v434_v60 }
 0x393   :  { %v833_v46 = vpop.permute.xlu1 %832 }
 0x394   :  { %1866 = vmatpush.xpose.msk.msra.mxu1 %vm530_vm5, %v833_v46 }
 0x39b   :  { %v831_v47 = vpop.permute.xlu1 %830 }
 0x39c   :  { %1867 = vmatpush.xpose.msk.msra.mxu1 %vm530_vm5, %v831_v47 }
 0x3a3   :  { %v827_v59 = vpop.permute.xlu1 %826 }
 0x3ac   :  { %v647_v19 = vpop.xlane.xlu2 %646 }
 0x3ad   :  { %v651_v50 = vsub.f32 %v632_v4, %v647_v19 }
 0x3af   :  { %v658_v48 = vmul.f32 1.442695, %v651_v50 }
 0x3b1   :  { %2097 = vpow2.f32 %v658_v48 }
 0x3b4   :  { %v829_v57 = vpop.permute.xlu2 %828 }
 0x3b5   :  { %v662_v29 = vpop.xlane.xlu0 %661 }
 0x3b6   :  { %2099 = vrcp.f32 %v662_v29 }
 0x3b7   :  { %v2640_v54 = vpop.eup %2097 }
 0x3b8   :  { %v669_v3 = vsel %vm635_vm6, %v2640_v54, 0.0 }
 0x3b9   :  { %670 = vadd.xlane.f32.xlu2 %v669_v3 }
 0x3bc   :  { %v2100_v53 = vpop.eup %2099 }
 0x3bd   :  { %v668_v56 = vpop.xlane.xlu0 %667  ;;  %v676_v28 = vmul.f32 %v2100_v53, %v2092_v8 }
 0x3be   :  { %2101 = vrcp.f32 %v668_v56 }
 0x3bf   :  { %1847 = vmatmul.msk.f32.vlgmr.msra.gmra.mxu0 %vm635_vm6, %v676_v28 }
 0x3c0   :  { %1863 = vmatpush.xpose.msk.msra.mxu0 %vm530_vm5, %v829_v57 }
 0x3c4   :  { %v2102_v60 = vpop.eup %2101  ;;  %1864 = vmatpush.xpose.msk.msra.mxu0 %vm530_vm5, %v827_v59 }
 0x3c5   :  { %v678_v63 = vmul.f32 %v2102_v60, %v2610_v10 }
 0x3c7   :  { %1849 = vmatmul.msk.f32.vlgmr.msrb.gmra.mxu0 %vm635_vm6, %v678_v63 }
 0x3ce   :  { %v288_v0 = vpop.xlane.xlu1 %287 }
 0x3cf   :  { %v292_v1 = vmul.f32 %v288_v0, %v2357_v14  ;;  %v1994_v0 = vld [vmem:[#allocation2 + $0x8] sm:$0xff] }
 0x3d0   :  { %v821_v42 = vpop.permute.xlu0 %820  ;;  %810 = vmatpush.bf16.msrb.mxu2 %v1994_v0 }
 0x3d1   :  { %818 = vrot.lane.b32.xlu2 %v2503_v40, %s2263_s18  ;;  %v296_v2 = vadd.f32 1e-05, %v292_v1  ;;  %v1993_v1 = vld [vmem:[#allocation2] sm:$0xff] }
 0x3d3   :  { %2103 = vrsqrt.f32 %v296_v2  ;;  %vm333_vm13 = vweird.f32 %v296_v2 }
 0x3d4   :  { %811 = vmatpush.bf16.msrb.mxu2 %v1993_v1 }
 0x3d9   :  { %v2104_v5 = vpop.eup %2103 }
 0x3da   :  { %v328_v8 = vmul.f32 %v2104_v5, %v296_v2  ;;  %vm334_vm14 = vweird.f32 %v2104_v5 }
 0x3db   :  { %vm335_vm15 = vmor %vm333_vm13, %vm334_vm14 }
 0x3dc   :  { %v329_v9 = vmul.f32 %v2104_v5, %v328_v8 }
 0x3de   :  { %v330_v15 = vmul.f32 0.5, %v329_v9 }
 0x3e0   :  { %v331_v16 = vsub.f32 1.5, %v330_v15 }
 0x3e2   :  { %v332_v21 = vmul.f32 %v2104_v5, %v331_v16 }
 0x3e4   :  { %v336_v23 = vsel %vm335_vm15, %v2104_v5, %v332_v21 }
 0x3e5   :  { %v340_v25 = vmul.f32 %v336_v23, %v2616_v13 }
 0x3e7   :  { %v344_v31 = vmul.f32 %v2449_v41, %v340_v25 }
 0x3e9   :  { %v348_v36 = vadd.f32 %v2457_v49, %v344_v31 }
 0x3ed   :  { %v665_v4 = vpop.xlane.xlu2 %664 }
 0x3ee   :  { %2105 = vrcp.f32 %v665_v4 }
 0x3f4   :  { %v2106_v61 = vpop.eup %2105 }
 0x3f5   :  { %v677_v6 = vmul.f32 %v2106_v61, %v2096_v26 }
 0x3f7   :  { %1848 = vmatmul.msk.f32.vlgmr.msrb.gmra.mxu3 %vm635_vm6, %v677_v6 }
 0x3f8   :  { %1869 = vmatpush.xpose.msk.msrb.mxu3 %vm530_vm5, %v2625_v18 }
 0x3fb   :  { %v285_v10 = vpop.xlane.xlu0 %284 }
 0x3fc   :  { %1870 = vmatpush.xpose.msk.msrb.mxu3 %vm530_vm5, %v835_v39  ;;  %v291_v7 = vmul.f32 %v285_v10, %v2357_v14 }
 0x3fe   :  { %v295_v12 = vadd.f32 1e-05, %v291_v7 }
 0x3ff   :  { %1862 = vmatmul.msk.f32.vlgmr.msra.gmra.mxu3 %vm530_vm5, %v2503_v40 }
 0x400   :  { %2107 = vrsqrt.f32 %v295_v12  ;;  %vm323_vm2 = vweird.f32 %v295_v12 }
 0x406   :  { %v2108_v17 = vpop.eup %2107 }
 0x407   :  { %v318_v22 = vmul.f32 %v2108_v17, %v295_v12  ;;  %1871 = vmatmul.msk.f32.vlgmr.msrb.gmra.mxu3 %vm530_vm5, %v823_v20  ;;  %vm324_vm1 = vweird.f32 %v2108_v17 }
 0x408   :  { %vm325_vm3 = vmor %vm323_vm2, %vm324_vm1 }
 0x409   :  { %v319_v18 = vmul.f32 %v2108_v17, %v318_v22 }
 0x40b   :  { %v320_v58 = vmul.f32 0.5, %v319_v18 }
 0x40d   :  { %v321_v24 = vsub.f32 1.5, %v320_v58 }
 0x40f   :  { %v322_v26 = vmul.f32 %v2108_v17, %v321_v24 }
 0x411   :  { %v326_v40 = vsel %vm325_vm3, %v2108_v17, %v322_v26 }
 0x412   :  { %v339_v27 = vmul.f32 %v326_v40, %v2630_v62 }
 0x414   :  { %v343_v33 = vmul.f32 %v2449_v41, %v339_v27 }
 0x416   :  { %v347_v34 = vadd.f32 %v2457_v49, %v343_v33 }
 0x418   :  { %v439_v11 = vpack.c.bf16 %v348_v36, %v347_v34  ;;  %v2006_v36 = vld [vmem:[%s3026_s6 + $0x18] sm:$0xff] }
 0x41a   :  { %1834 = vmatmul.msk.bf16.gmra.mxu2 %vm95_vm0, %v439_v11 }
 0x42c   :  { %v671_v38 = vpop.xlane.xlu2 %670 }
 0x42d   :  { %2109 = vrcp.f32 %v671_v38  ;;  %v2005_v38 = vld [vmem:[%s3026_s6 + $0x10] sm:$0xff] }
 0x433   :  { %v2110_v13 = vpop.eup %2109 }
 0x434   :  { %v679_v43 = vmul.f32 %v2110_v13, %v2640_v54  ;;  %v819_v44 = vpop.permute.xlu2 %818 }
 0x435   :  { %1865 = vmatmul.msk.f32.vlgmr.msra.gmra.mxu0 %vm530_vm5, %v819_v44 }
 0x436   :  { %1850 = vmatmul.msk.f32.vlgmr.msrb.gmra.mxu1 %vm635_vm6, %v679_v43 }
 0x43c   :  { %v700_v39 = vpop.f32.mrf.mxu0 }
 0x43e   :  { %1868 = vmatmul.msk.f32.vlgmr.msra.gmra.mxu1 %vm530_vm5, %v821_v42 }
 0x444   :  { %v746_v47 = vpop.f32.mrf.mxu0 }
 0x47a   :  { %v723_v41 = vpop.f32.mrf.mxu3 }
 0x482   :  { %v2671_v62 = vpop.f32.mrf.mxu3 }
 0x483   :  { %v962_v28 = vsel %vm635_vm6, %v2671_v62, -inf }
 0x48a   :  { %v959_v45 = vpop.f32.mrf.mxu3 }
 0x48b   :  { %v971_v49 = vsel %vm635_vm6, %v959_v45, -inf }
 0x48c   :  { %972 = vmax.xlane.f32.xlu0 %v971_v49 }
 0x49d   :  { %v480_v46 = vpop.f32.mrf.mxu2 }
 0x49e   :  { %v481_v20 = vadd.f32 %v2591_v55, %v480_v46 }
 0x4a0   :  { %777 = vrot.lane.b32.xlu0 %v746_v47, %s2259_s29 }
 0x4a5   :  { %v482_v19 = vpop.f32.mrf.mxu2 }
 0x4a6   :  { %v483_v50 = vadd.f32 %v2591_v55, %v482_v19 }
 0x4a8   :  { %1023 = vmatpush.msrb.mxu0 %v483_v50  ;;  %v2051_v48 = vpack.i.bf16 %v481_v20, %v483_v50 }
 0x4aa   :  { %1024 = vmatpush.msrb.mxu0 %v481_v20 }
 0x4ac   :  { %1123 = vmatpush.bf16.msra.mxu0 %v1994_v0 }
 0x4b0   :  { %1124 = vmatpush.bf16.msra.mxu0 %v1993_v1 }
 0x4b2   :  { %v907_v29 = vpop.f32.mrf.mxu0 }
 0x4b3   :  { %v769_v54 = vpop.f32.mrf.mxu1  ;;  %v965_v3 = vsel %vm635_vm6, %v907_v29, -inf }
 0x4b4   :  { %966 = vmax.xlane.f32.xlu1 %v965_v3 }
 0x4bb   :  { %v933_v53 = vpop.f32.mrf.mxu1 }
 0x4bc   :  { %v968_v56 = vsel %vm635_vm6, %v933_v53, -inf }
 0x4bd   :  { %969 = vmax.xlane.f32.xlu2 %v968_v56  ;;  %v2069_v56 = vld [vmem:[%s3027_s7 + $0x1] ss:$0 sm:$0xff] }
 0x4ca   :  { %963 = vmax.xlane.f32.xlu0 %v962_v28 }
 0x4cd   :  { %781 = vrot.lane.b32.xlu1 %v769_v54, %s2265_s4  ;;  %v2014_v54 = vld [vmem:[%s3028_s8 + $0x78] sm:$0xff] }
 0x4d5   :  { %773 = vrot.lane.b32.xlu2 %v723_v41, %s2266_s9 }
 0x4ff   :  { %v973_v55 = vpop.xlane.xlu0 %972 }
 0x500   :  { %v977_v57 = vsub.f32 %v959_v45, %v973_v55 }
 0x502   :  { %v984_v59 = vmul.f32 1.442695, %v977_v57 }
 0x504   :  { %2111 = vpow2.f32 %v984_v59 }
 0x50a   :  { %v2112_v60 = vpop.eup %2111 }
 0x50b   :  { %v995_v63 = vsel %vm635_vm6, %v2112_v60, 0.0 }
 0x50c   :  { %996 = vadd.xlane.f32.xlu1 %v995_v63 }
 0x512   :  { %v778_v16 = vpop.permute.xlu0 %777 }
 0x525   :  { %2052 = vrot.lane.b32.xlu1 %v2051_v48, %s2262_s17  ;;  %s2269_s17 = smov [#allocation7]  }
 0x527   :  { %v967_v2 = vpop.xlane.xlu1 %966 }
 0x528   :  { %v975_v4 = vsub.f32 %v907_v29, %v967_v2 }
 0x52a   :  { %v980_v5 = vmul.f32 1.442695, %v975_v4 }
 0x52c   :  { %2113 = vpow2.f32 %v980_v5 }
 0x530   :  { %v970_v42 = vpop.xlane.xlu2 %969 }
 0x531   :  { %v976_v61 = vsub.f32 %v933_v53, %v970_v42  ;;  %v2719_v53 = vld [vmem:[#allocation5 + $0x4] ss:$0 sm:$0xff] }
 0x532   :  { %v2114_v6 = vpop.eup %2113 }
 0x533   :  { %v982_v8 = vmul.f32 1.442695, %v976_v61  ;;  %v989_v9 = vsel %vm635_vm6, %v2114_v6, 0.0 }
 0x534   :  { %990 = vadd.xlane.f32.xlu0 %v989_v9 }
 0x535   :  { %2115 = vpow2.f32 %v982_v8 }
 0x538   :  { %v774_v10 = vpop.permute.xlu2 %773 }
 0x539   :  { %v784_v12 = vsel %vm530_vm5, %v700_v39, %v774_v10 }
 0x53a   :  { %v785_v21 = vsel %vm635_vm6, %v784_v12, %v778_v16 }
 0x53b   :  { %v2116_v7 = vpop.eup %2115 }
 0x53c   :  { %v992_v15 = vsel %vm635_vm6, %v2116_v7, 0.0 }
 0x53d   :  { %993 = vadd.xlane.f32.xlu2 %v992_v15  ;;  %v964_v23 = vpop.xlane.xlu0 %963 }
 0x53e   :  { %v974_v58 = vsub.f32 %v2671_v62, %v964_v23 }
 0x53f   :  { %v782_v17 = vpop.permute.xlu1 %781 }
 0x540   :  { %v787_v22 = vsel %vm786_vm4, %v785_v21, %v782_v17  ;;  %v978_v24 = vmul.f32 1.442695, %v974_v58 }
 0x541   :  { %v788_v18 = vpack.c.bf16 %v787_v22, %v787_v22 }
 0x542   :  { %2117 = vpow2.f32 %v978_v24 }
 0x543   :  { %1859 = vmatmul.msk.bf16.vlgmr.msrb.gmra.mxu2 %vm95_vm0, %v788_v18 }
 0x548   :  { %2057 = vrot.lane.b32.xlu0 %v2051_v48, %s2263_s18  ;;  %v2118_v25 = vpop.eup %2117  ;;  %s1767_s18 = sshll.u32 %s2269_s17, 4  ;;  %s1768_s18 = int_to_ptr.vmem [resolvable:$true] %s1767_s18 }
 0x549   :  { %v986_v26 = vsel %vm635_vm6, %v2118_v25, 0.0 }
 0x555   :  { %2047 = vrot.lane.b32.xlu2 %v2051_v48, %s2264_s21 }
 0x57e   :  { %987 = vadd.xlane.f32.xlu2 %v986_v26 }
 0x57f   :  { %v997_v40 = vpop.xlane.xlu1 %996 }
 0x580   :  { %2119 = vrcp.f32 %v997_v40 }
 0x586   :  { %v2120_v31 = vpop.eup %2119 }
 0x587   :  { %v1005_v11 = vmul.f32 %v2120_v31, %v2112_v60  ;;  %v2143_v60 = vld [vmem:[%s3020_s0] sm:$0xff] }
 0x597   :  { %v2053_v27 = vpop.permute.xlu1 %2052 }
 0x598   :  { %v2054_v33 = vunpack.i.l.bf16 %v2053_v27  ;;  %v2055_v34 = vunpack.i.h.bf16 %v2053_v27 }
 0x59a   :  { %1092 = vmatpush.msra.mxu3 %v2054_v33 }
 0x59c   :  { %1093 = vmatpush.msra.mxu3 %v2055_v34 }
 0x59d   :  { %1875 = vmatmul.msk.f32.vlgmr.msra.gmra.mxu3 %vm635_vm6, %v1005_v11 }
 0x59e   :  { %1464 = vmatpush.bf16.msrb.mxu3 %v2006_v36 }
 0x5a2   :  { %1465 = vmatpush.bf16.msrb.mxu3 %v2005_v38 }
 0x5a5   :  { %1933 = vmatmul.msk.bf16.vlgmr.msrb.gmra.mxu3 %vm95_vm0, %v1428_v30 }
 0x5a7   :  { %v991_v43 = vpop.xlane.xlu0 %990 }
 0x5b0   :  { %v994_v13 = vpop.xlane.xlu2 %993 }
 0x5b1   :  { %2121 = vrcp.f32 %v994_v13 }
 0x5b2   :  { %2123 = vrcp.f32 %v991_v43 }
 0x5b5   :  { %1934 = vmatmul.msk.bf16.gmra.mxu3 %vm95_vm0, %v1429_v35 }
 0x5b7   :  { %v2122_v41 = vpop.eup %2121 }
 0x5b8   :  { %v2048_v44 = vpop.permute.xlu2 %2047  ;;  %v2124_v49 = vpop.eup %2123  ;;  %v1004_v51 = vmul.f32 %v2122_v41, %v2116_v7 }
 0x5b9   :  { %v2049_v62 = vunpack.i.l.bf16 %v2048_v44  ;;  %v2050_v39 = vunpack.i.h.bf16 %v2048_v44  ;;  %v1003_v30 = vmul.f32 %v2124_v49, %v2114_v6 }
 0x5ba   :  { %v2058_v45 = vpop.permute.xlu0 %2057 }
 0x5bb   :  { %v2059_v46 = vunpack.i.l.bf16 %v2058_v45  ;;  %1069 = vmatpush.msra.mxu2 %v2049_v62  ;;  %v2060_v52 = vunpack.i.h.bf16 %v2058_v45 }
 0x5bd   :  { %1046 = vmatpush.msrb.mxu1 %v2059_v46  ;;  %1070 = vmatpush.msra.mxu2 %v2050_v39 }
 0x5be   :  { %1874 = vmatmul.msk.f32.vlgmr.msra.gmra.mxu2 %vm635_vm6, %v1004_v51  ;;  %v2013_v51 = vld [vmem:[%s3028_s8 + $0x70] sm:$0xff] }
 0x5bf   :  { %1047 = vmatpush.msrb.mxu1 %v2060_v52 }
 0x5c0   :  { %1873 = vmatmul.msk.f32.vlgmr.msrb.gmra.mxu1 %vm635_vm6, %v1003_v30 }
 0x5c6   :  { %v813_v32 = vpop.f32.mrf.mxu2 }
 0x5c7   :  { %v1133_v28 = vadd.f32 %v2719_v53, %v813_v32 }
 0x5c9   :  { %v2732_v63 = vadd.f32 %v2143_v60, %v1133_v28  ;;  %v2011_v28 = vld [vmem:[%s3028_s8 + $0x60] sm:$0xff] }
 0x5cb   :  { %v1137_v4 = vsel %vm95_vm0, %v2732_v63, 0.0 }
 0x5ce   :  { %v815_v37 = vpop.f32.mrf.mxu2 }
 0x5f1   :  { %v988_v35 = vpop.xlane.xlu2 %987 }
 0x5f2   :  { %2125 = vrcp.f32 %v988_v35 }
 0x5f8   :  { %v2126_v47 = vpop.eup %2125 }
 0x5f9   :  { %v1002_v19 = vmul.f32 %v2126_v47, %v2118_v25 }
 0x5fb   :  { %1872 = vmatmul.msk.f32.vlgmr.msrb.gmra.mxu0 %vm635_vm6, %v1002_v19  ;;  %v2012_v19 = vld [vmem:[%s3028_s8 + $0x68] sm:$0xff] }
 0x5fc   :  { %1723 = vmatpush.bf16.msrb.mxu0 %v2014_v54 }
 0x600   :  { %1724 = vmatpush.bf16.msrb.mxu0 %v2013_v51 }
 0x604   :  { %1725 = vmatpush.bf16.msrb.mxu0 %v2012_v19 }
 0x608   :  { %1726 = vmatpush.bf16.msrb.mxu0 %v2011_v28 }
 0x620   :  { %v1095_v48 = vpop.f32.mrf.mxu3 }
 0x628   :  { %v1467_v29 = vpop.f32.mrf.mxu3 }
 0x629   :  { %v2727_v57 = vadd.f32 %v2069_v56, %v1467_v29 }
 0x62b   :  { %v2738_v1 = vmul.f32 0.70710677, %v2727_v57 }
 0x62d   :  { %v1485_v5 = vmul.f32 %v2738_v1, %v2738_v1 }
 0x62f   :  { %v2748_v61 = vmin.f32 %v1485_v5, 16.0 }
 0x630   :  { %v1469_v3 = vpop.f32.mrf.mxu3 }
 0x631   :  { %v2725_v55 = vadd.f32 %v2069_v56, %v1469_v3  ;;  %v1498_v10 = vmul.f32 3.8918573e-05, %v2748_v61  ;;  %v1487_v39 = vmul.f32 2.1237322e-06, %v2748_v61 }
 0x633   :  { %v2735_v0 = vmul.f32 0.70710677, %v2725_v55  ;;  %v1499_v16 = vadd.f32 0.001143296, %v1498_v10  ;;  %v1488_v35 = vadd.f32 0.00028619796, %v1487_v39 }
 0x635   :  { %v1525_v2 = vmul.f32 %v2735_v0, %v2735_v0  ;;  %v1500_v18 = vmul.f32 %v1499_v16, %v2748_v61  ;;  %v1489_v54 = vmul.f32 %v1488_v35, %v2748_v61  ;;  %v2009_v16 = vld [vmem:[%s3028_s8 + $0x50] sm:$0xff] }
 0x637   :  { %v2746_v42 = vmin.f32 %v1525_v2, 16.0  ;;  %v1501_v25 = vadd.f32 0.014752088, %v1500_v18  ;;  %v1490_v2 = vadd.f32 0.0036580483, %v1489_v54 }
 0x638   :  { %v1472_v59 = vpop.f32.mrf.mxu3 }
 0x639   :  { %v1538_v8 = vmul.f32 3.8918573e-05, %v2746_v42  ;;  %v2754_v7 = vadd.f32 %v2069_v56, %v1472_v59  ;;  %v1502_v31 = vmul.f32 %v1501_v25, %v2748_v61  ;;  %v1527_v62 = vmul.f32 2.1237322e-06, %v2746_v42 }
 0x63a   :  { %v1491_v10 = vmul.f32 %v1490_v2, %v2748_v61 }
 0x63b   :  { %v1539_v12 = vadd.f32 0.001143296, %v1538_v8  ;;  %v2760_v17 = vmul.f32 0.70710677, %v2754_v7  ;;  %v1503_v11 = vadd.f32 0.112945676, %v1502_v31 }
 0x63c   :  { %v1528_v30 = vadd.f32 0.00028619796, %v1527_v62  ;;  %v2007_v62 = vld [vmem:[%s3028_s8 + $0x40] sm:$0xff] }
 0x63d   :  { %v1049_v20 = vpop.f32.mrf.mxu1  ;;  %v1540_v21 = vmul.f32 %v1539_v12, %v2746_v42  ;;  %v1565_v23 = vmul.f32 %v2760_v17, %v2760_v17  ;;  %v1504_v44 = vmul.f32 %v1503_v11, %v2748_v61 }
 0x63e   :  { %1099 = vrot.lane.b32.xlu0 %v1049_v20, %s2266_s9 }
 0x63f   :  { %v1541_v58 = vadd.f32 0.014752088, %v1540_v21  ;;  %v2770_v26 = vmin.f32 %v1565_v23, 16.0  ;;  %v1505_v46 = vadd.f32 0.4994258, %v1504_v44 }
 0x640   :  { %v1474_v6 = vpop.f32.mrf.mxu3 }
 0x641   :  { %v1072_v50 = vpop.f32.mrf.mxu2  ;;  %v2751_v9 = vadd.f32 %v2069_v56, %v1474_v6  ;;  %v1542_v40 = vmul.f32 %v1541_v58, %v2746_v42  ;;  %v1578_v33 = vmul.f32 3.8918573e-05, %v2770_v26  ;;  %v1506_v47 = vmul.f32 %v1505_v46, %v2748_v61 }
 0x642   :  { %1103 = vrot.lane.b32.xlu1 %v1072_v50, %s2259_s29  ;;  %v1529_v50 = vmul.f32 %v1528_v30, %v2746_v42 }
 0x643   :  { %v2757_v15 = vmul.f32 0.70710677, %v2751_v9  ;;  %v1543_v34 = vadd.f32 0.112945676, %v1542_v40  ;;  %v1579_v38 = vadd.f32 0.001143296, %v1578_v33 }
 0x644   :  { %v2796_v3 = vadd.f32 1.0, %v1506_v47  ;;  %v1530_v59 = vadd.f32 0.0036580483, %v1529_v50  ;;  %v1492_v40 = vadd.f32 0.05243302, %v1491_v10  ;;  %v2008_v33 = vld [vmem:[%s3028_s8 + $0x48] sm:$0xff] }
 0x645   :  { %v1605_v22 = vmul.f32 %v2757_v15, %v2757_v15  ;;  %v1544_v13 = vmul.f32 %v1543_v34, %v2746_v42  ;;  %v1580_v41 = vmul.f32 %v1579_v38, %v2770_v26 }
 0x646   :  { %1107 = vrot.lane.b32.xlu0 %v1095_v48, %s2265_s4  ;;  %v1531_v6 = vmul.f32 %v1530_v59, %v2746_v42  ;;  %vm1513_vm10 = vweird.f32 %v2796_v3 }
 0x647   :  { %v2768_v24 = vmin.f32 %v1605_v22, 16.0  ;;  %v1545_v45 = vadd.f32 0.4994258, %v1544_v13  ;;  %v1581_v52 = vadd.f32 0.014752088, %v1580_v41 }
 0x648   :  { %v1567_v22 = vmul.f32 2.1237322e-06, %v2770_v26  ;;  %v1532_v58 = vadd.f32 0.05243302, %v1531_v6 }
 0x649   :  { %v1618_v27 = vmul.f32 3.8918573e-05, %v2768_v24  ;;  %v1546_v32 = vmul.f32 %v1545_v45, %v2746_v42  ;;  %v1582_v20 = vmul.f32 %v1581_v52, %v2770_v26  ;;  %v1607_v12 = vmul.f32 2.1237322e-06, %v2768_v24 }
 0x64a   :  { %v1533_v38 = vmul.f32 %v1532_v58, %v2746_v42 }
 0x64b   :  { %v1619_v36 = vadd.f32 0.001143296, %v1618_v27  ;;  %v2793_v48 = vadd.f32 1.0, %v1546_v32  ;;  %v1583_v56 = vadd.f32 0.112945676, %v1582_v20 }
 0x64c   :  { %v1608_v31 = vadd.f32 0.00028619796, %v1607_v12  ;;  %v1534_v46 = vadd.f32 0.18741608, %v1533_v38 }
 0x64d   :  { %v1620_v43 = vmul.f32 %v1619_v36, %v2768_v24  ;;  %2127 = vrcp.f32 %v2793_v48  ;;  %v1584_v5 = vmul.f32 %v1583_v56, %v2770_v26  ;;  %v1568_v36 = vadd.f32 0.00028619796, %v1567_v22 }
 0x64e   :  { %2129 = vrcp.f32 %v2796_v3  ;;  %v1609_v41 = vmul.f32 %v1608_v31, %v2768_v24  ;;  %v1535_v35 = vmul.f32 %v1534_v46, %v2746_v42  ;;  %v1559_v56 = vand.u32 2147483648, %v2793_v48 }
 0x64f   :  { %v1621_v49 = vadd.f32 0.014752088, %v1620_v43  ;;  %v1585_v18 = vadd.f32 0.4994258, %v1584_v5  ;;  %v1493_v43 = vmul.f32 %v1492_v40, %v2748_v61  ;;  %v1519_v42 = vand.u32 2147483648, %v2796_v3 }
 0x650   :  { %v1610_v30 = vadd.f32 0.0036580483, %v1609_v41  ;;  %vm1553_vm9 = vweird.f32 %v2793_v48  ;;  %v1536_v2 = vadd.f32 1.1283791, %v1535_v35  ;;  %v1560_v12 = vor.u32 1.1754944e-38, %v1559_v56 }
 0x651   :  { %v1622_v37 = vmul.f32 %v1621_v49, %v2768_v24  ;;  %v1586_v11 = vmul.f32 %v1585_v18, %v2770_v26  ;;  %v1569_v49 = vmul.f32 %v1568_v36, %v2770_v26  ;;  %v1494_v51 = vadd.f32 0.18741608, %v1493_v43 }
 0x652   :  { %v1611_v20 = vmul.f32 %v1610_v30, %v2768_v24  ;;  %v1520_v18 = vor.u32 1.1754944e-38, %v1519_v42  ;;  %v1477_v42 = vmul.f32 0.5, %v2727_v57 }
 0x653   :  { %v1623_v29 = vadd.f32 0.112945676, %v1622_v37  ;;  %v2814_v21 = vpop.eup %2127  ;;  %v2837_v39 = vadd.f32 1.0, %v1586_v11  ;;  %v1570_v37 = vadd.f32 0.0036580483, %v1569_v49  ;;  %v1495_v47 = vmul.f32 %v1494_v51, %v2748_v61 }
 0x654   :  { %v2817_v23 = vpop.eup %2129  ;;  %v1549_v27 = vmul.f32 %v2814_v21, %v2793_v48  ;;  %vm1554_vm7 = vweird.f32 %v2814_v21  ;;  %v1557_v61 = vand.u32 2147483647, %v2793_v48  ;;  %v1612_v6 = vadd.f32 0.05243302, %v1611_v20 }
 0x655   :  { %v1624_v60 = vmul.f32 %v1623_v29, %v2768_v24  ;;  %v1509_v34 = vmul.f32 %v2817_v23, %v2796_v3  ;;  %vm1514_vm8 = vweird.f32 %v2817_v23  ;;  %v1571_v28 = vmul.f32 %v1570_v37, %v2770_v26  ;;  %vm2863_vm11 = vmor %vm1553_vm9, %vm1554_vm7 }
 0x656   :  { %v1550_v44 = vsub.f32 1.0, %v1549_v27  ;;  %vm2867_vm12 = vmor %vm1513_vm10, %vm1514_vm8  ;;  %vm1558_vm13 = vcmp.eq.f32.partialorder %v1557_v61, 8.507059e+37  ;;  %vm1593_vm2 = vweird.f32 %v2837_v39 }
 0x657   :  { %v1625_v8 = vadd.f32 0.4994258, %v1624_v60  ;;  %v1510_v45 = vsub.f32 1.0, %v1509_v34  ;;  %v1517_v60 = vand.u32 2147483647, %v2796_v3 }
 0x658   :  { %v1551_v52 = vmul.f32 %v2814_v21, %v1550_v44  ;;  %v1496_v3 = vadd.f32 1.1283791, %v1495_v47 }
 0x659   :  { %v1626_v25 = vmul.f32 %v1625_v8, %v2768_v24  ;;  %v1511_v32 = vmul.f32 %v2817_v23, %v1510_v45  ;;  %vm1518_vm14 = vcmp.eq.f32.partialorder %v1517_v60, 8.507059e+37 }
 0x65a   :  { %v1552_v19 = vadd.f32 %v2814_v21, %v1551_v52  ;;  %v1497_v11 = vmul.f32 %v1496_v3, %v2738_v1 }
 0x65b   :  { %v2829_v13 = vadd.f32 1.0, %v1626_v25  ;;  %v1512_v54 = vadd.f32 %v2817_v23, %v1511_v32 }
 0x65c   :  { %v1556_v48 = vsel %vm2863_vm11, %v2814_v21, %v1552_v19  ;;  %v1537_v21 = vmul.f32 %v1536_v2, %v2735_v0 }
 0x65d   :  { %2131 = vrcp.f32 %v2829_v13  ;;  %v1516_v10 = vsel %vm2867_vm12, %v2817_v23, %v1512_v54  ;;  %v1561_v40 = vsel %vm1558_vm13, %v1560_v12, %v1556_v48  ;;  %v1639_v35 = vand.u32 2147483648, %v2829_v13 }
 0x65e   :  { %2133 = vrcp.f32 %v2837_v39  ;;  %v1521_v31 = vsel %vm1518_vm14, %v1520_v18, %v1516_v10  ;;  %v1562_v44 = vmul.f32 %v1561_v40, %v1537_v21  ;;  %vm1633_vm15 = vweird.f32 %v2829_v13 }
 0x65f   :  { %v1522_v0 = vmul.f32 %v1521_v31, %v1497_v11  ;;  %v1637_v20 = vand.u32 2147483647, %v2829_v13  ;;  %v1599_v54 = vand.u32 2147483648, %v2837_v39  ;;  %v1640_v61 = vor.u32 1.1754944e-38, %v1639_v35  ;;  %v1995_v35 = vld [vmem:[%s3026_s6] sm:$0xff] }
 0x660   :  { %v1936_v51 = vclamps-f32 %v1562_v44, 1.0 }
 0x661   :  { %v1935_v30 = vclamps-f32 %v1522_v0, 1.0  ;;  %v1600_v2 = vor.u32 1.1754944e-38, %v1599_v54 }
 0x662   :  { %v1646_v47 = vadd.f32 1.0, %v1936_v51 }
 0x663   :  { %v2848_v29 = vpop.eup %2131 }
 0x664   :  { %v2857_v59 = vpop.eup %2133  ;;  %v1629_v8 = vmul.f32 %v2848_v29, %v2829_v13 }
 0x665   :  { %v1589_v25 = vmul.f32 %v2857_v59, %v2837_v39 }
 0x666   :  { %v1630_v36 = vsub.f32 1.0, %v1629_v8 }
 0x668   :  { %v1631_v49 = vmul.f32 %v2848_v29, %v1630_v36  ;;  %v2924_v36 = vld [vmem:[#allocation5 + $0x6] ss:$0 sm:$0xff] }
 0x66a   :  { %v1632_v32 = vadd.f32 %v2848_v29, %v1631_v49  ;;  %v2145_v49 = vld [vmem:[%s3021_s1 + $0x8] sm:$0xff] }
 0x66c   :  { %1138 = vadd.xlane.f32.xlu1 %v1137_v4  ;;  %v2010_v4 = vld [vmem:[%s3028_s8 + $0x58] sm:$0xff] }
 0x66d   :  { %1727 = vmatpush.bf16.msrb.mxu0 %v2010_v4 }
 0x671   :  { %1728 = vmatpush.bf16.msrb.mxu0 %v2009_v16  ;;  %v1572_v16 = vadd.f32 0.05243302, %v1571_v28 }
 0x673   :  { %v1573_v38 = vmul.f32 %v1572_v16, %v2770_v26  ;;  %v1480_v16 = vmul.f32 0.5, %v2751_v9  ;;  %v2144_v9 = vld [vmem:[%s3020_s0 + $0x8] sm:$0xff]  ;;  %s2268_s0 = smov 96  }
 0x675   :  { %1729 = vmatpush.bf16.msrb.mxu0 %v2008_v33  ;;  %v1613_v33 = vmul.f32 %v1612_v6, %v2768_v24  ;;  %v1574_v46 = vadd.f32 0.18741608, %v1573_v38 }
 0x677   :  { %v1614_v45 = vadd.f32 0.18741608, %v1613_v33  ;;  %v1575_v37 = vmul.f32 %v1574_v46, %v2770_v26  ;;  %v1597_v26 = vand.u32 2147483647, %v2837_v39 }
 0x678   :  { %v1026_v58 = vpop.f32.mrf.mxu0 }
 0x679   :  { %1730 = vmatpush.bf16.msrb.mxu0 %v2007_v62  ;;  %v1590_v62 = vsub.f32 1.0, %v1589_v25  ;;  %v1615_v1 = vmul.f32 %v1614_v45, %v2768_v24  ;;  %v1478_v24 = vmul.f32 0.5, %v2725_v55  ;;  %v1576_v60 = vadd.f32 1.1283791, %v1575_v37 }
 0x67a   :  { %vm1598_vm7 = vcmp.eq.f32.partialorder %v1597_v26, 8.507059e+37 }
 0x67b   :  { %v1591_v52 = vmul.f32 %v2857_v59, %v1590_v62  ;;  %v1616_v56 = vadd.f32 1.1283791, %v1615_v1  ;;  %v1650_v13 = vmul.f32 %v1646_v47, %v1478_v24 }
 0x67d   :  { %v1592_v19 = vadd.f32 %v2857_v59, %v1591_v52  ;;  %v1617_v48 = vmul.f32 %v1616_v56, %v2757_v15 }
 0x6b0   :  { %v1100_v50 = vpop.permute.xlu0 %1099 }
 0x6b1   :  { %v1110_v27 = vsel %vm530_vm5, %v1026_v58, %v1100_v50  ;;  %vm1634_vm5 = vweird.f32 %v2848_v29  ;;  %v1645_v50 = vadd.f32 1.0, %v1935_v30 }
 0x6b2   :  { %vm1635_vm1 = vmor %vm1633_vm15, %vm1634_vm5 }
 0x6b3   :  { %v1636_v28 = vsel %vm1635_vm1, %v2848_v29, %v1632_v32  ;;  %v1649_v5 = vmul.f32 %v1645_v50, %v1477_v42  ;;  %v1577_v29 = vmul.f32 %v1576_v60, %v2760_v17  ;;  %v1996_v32 = vld [vmem:[%s3026_s6 + $0x8] sm:$0xff]  ;;  %s1769_s6 = sshll.u32 %s3030_s10, 4  ;;  %s2270_s10 = smov [#allocation8]   ;;  %s1770_s6 = int_to_ptr.hbm [resolvable:$true] %s1769_s6 }
 0x6b4   :  { %v1104_v22 = vpop.permute.xlu1 %1103  ;;  %1221 = vmatpush.bf16.msra.mxu1 %v1996_v32  ;;  %s1778_s21 = sshll.u32 %s2270_s10, 4  ;;  %s1779_s21 = int_to_ptr.vmem [resolvable:$true] %s1778_s21 }
 0x6b5   :  { %v1111_v23 = vsel %vm635_vm6, %v1110_v27, %v1104_v22  ;;  %vm1594_vm6 = vweird.f32 %v2857_v59  ;;  %v1653_v6 = vpack.c.bf16 %v1650_v13, %v1649_v5  ;;  %v1479_v22 = vmul.f32 0.5, %v2754_v7 }
 0x6b6   :  { %vm1595_vm3 = vmor %vm1593_vm2, %vm1594_vm6 }
 0x6b7   :  { %v1596_v55 = vsel %vm1595_vm3, %v2857_v59, %v1592_v19 }
 0x6b8   :  { %v1108_v34 = vpop.permute.xlu0 %1107  ;;  %v1601_v39 = vsel %vm1598_vm7, %v1600_v2, %v1596_v55  ;;  %1222 = vmatpush.bf16.msra.mxu1 %v1995_v35  ;;  %vm1415_vm7 = vcmask 523264  }
 0x6b9   :  { %v1112_v43 = vsel %vm786_vm4, %v1111_v23, %v1108_v34  ;;  %vm1638_vm4 = vcmp.eq.f32.partialorder %v1637_v20, 8.507059e+37  ;;  %v1602_v8 = vmul.f32 %v1601_v39, %v1577_v29 }
 0x6ba   :  { %v1113_v41 = vpack.c.bf16 %v1112_v43, %v1112_v43  ;;  %v1641_v4 = vsel %vm1638_vm4, %v1640_v61, %v1636_v28 }
 0x6bb   :  { %v1642_v57 = vmul.f32 %v1641_v4, %v1617_v48  ;;  %v1937_v10 = vclamps-f32 %v1602_v8, 1.0  ;;  %v2146_v4 = vld [vmem:[#allocation5 + $0x2] ss:$0 sm:$0xff] }
 0x6bc   :  { %1876 = vmatmul.msk.bf16.vlgmr.msra.gmra.mxu0 %vm95_vm0, %v1113_v41 }
 0x6bd   :  { %v1938_v3 = vclamps-f32 %v1642_v57, 1.0  ;;  %v1647_v59 = vadd.f32 1.0, %v1937_v10 }
 0x6bf   :  { %v1648_v12 = vadd.f32 1.0, %v1938_v3  ;;  %v1651_v58 = vmul.f32 %v1647_v59, %v1479_v22  ;;  %v2071_v3 = vld [vmem:[%s3027_s7] ss:$0 sm:$0xff]  ;;  %v2004_v22 = vld [vmem:[%s3028_s8 + $0x38] sm:$0xff] }
 0x6c0   :  { %1385 = vmatpush.bf16.msrb.mxu2 %v2004_v22 }
 0x6c1   :  { %v1652_v18 = vmul.f32 %v1648_v12, %v1480_v16 }
 0x6c3   :  { %v1654_v25 = vpack.c.bf16 %v1652_v18, %v1651_v58 }
 0x6cc   :  { %1731 = vmatmul.bf16.vlgmr.msrb.gmra.mxu0 %v1653_v6  ;;  %v2147_v6 = vld [vmem:[#allocation5 + $0x3] ss:$0 sm:$0xff] }
 0x6dc   :  { %1736 = vmatmul.bf16.gmra.mxu0 %v1654_v25 }
 0x6df   :  { %v1139_v15 = vpop.xlane.xlu1 %1138 }
 0x6e0   :  { %v1143_v21 = vmul.f32 %v1139_v15, %v2357_v14 }
 0x6e2   :  { %v1145_v17 = vsub.f32 %v2732_v63, %v1143_v21 }
 0x6e4   :  { %v1147_v40 = vmul.f32 %v1145_v17, %v1145_v17 }
 0x6e6   :  { %v1149_v27 = vsel %vm95_vm0, %v1147_v40, 0.0 }
 0x6e7   :  { %1150 = vadd.xlane.f32.xlu2 %v1149_v27 }
 0x739   :  { %v1126_v31 = vpop.f32.mrf.mxu0 }
 0x73a   :  { %v1134_v33 = vadd.f32 %v2719_v53, %v1126_v31 }
 0x73c   :  { %v2920_v7 = vadd.f32 %v2144_v9, %v1134_v33  ;;  %v2002_v9 = vld [vmem:[%s3028_s8 + $0x28] sm:$0xff] }
 0x73e   :  { %v1140_v23 = vsel %vm95_vm0, %v2920_v7, 0.0 }
 0x73f   :  { %1141 = vadd.xlane.f32.xlu0 %v1140_v23 }
 0x741   :  { %v1128_v34 = vpop.f32.mrf.mxu0 }
 0x749   :  { %v1732_v11 = vpop.f32.mrf.mxu0 }
 0x74a   :  { %v2927_v38 = vadd.f32 %v2924_v36, %v1732_v11 }
 0x751   :  { %v1734_v0 = vpop.f32.mrf.mxu0 }
 0x752   :  { %v1735_v45 = vadd.f32 %v2924_v36, %v1734_v0 }
 0x754   :  { %v1743_v46 = vadd.f32 %v2145_v49, %v1735_v45 }
 0x75a   :  { %v1151_v51 = vpop.xlane.xlu2 %1150 }
 0x75b   :  { %v1155_v52 = vmul.f32 %v1151_v51, %v2357_v14 }
 0x75d   :  { %v1157_v30 = vadd.f32 1e-05, %v1155_v52  ;;  %v2000_v52 = vld [vmem:[%s3028_s8 + $0x18] sm:$0xff] }
 0x75f   :  { %2135 = vrsqrt.f32 %v1157_v30  ;;  %vm1165_vm9 = vweird.f32 %v1157_v30 }
 0x765   :  { %v2136_v1 = vpop.eup %2135 }
 0x766   :  { %v1160_v37 = vmul.f32 %v2136_v1, %v1157_v30  ;;  %vm1166_vm8 = vweird.f32 %v2136_v1 }
 0x767   :  { %vm1167_vm10 = vmor %vm1165_vm9, %vm1166_vm8  ;;  %vm1417_vm8 = vcmask 785408  }
 0x768   :  { %v1161_v47 = vmul.f32 %v2136_v1, %v1160_v37 }
 0x76a   :  { %v1162_v24 = vmul.f32 0.5, %v1161_v47 }
 0x76c   :  { %v1163_v54 = vsub.f32 1.5, %v1162_v24 }
 0x76e   :  { %v1164_v26 = vmul.f32 %v2136_v1, %v1163_v54 }
 0x770   :  { %v1168_v61 = vsel %vm1167_vm10, %v2136_v1, %v1164_v26 }
 0x771   :  { %v1179_v55 = vmul.f32 %v1168_v61, %v1145_v17  ;;  %v2003_v17 = vld [vmem:[%s3028_s8 + $0x30] sm:$0xff] }
 0x772   :  { %1386 = vmatpush.bf16.msrb.mxu2 %v2003_v17 }
 0x773   :  { %v1184_v5 = vmul.f32 %v2146_v4, %v1179_v55 }
 0x775   :  { %v1189_v29 = vadd.f32 %v2147_v6, %v1184_v5 }
 0x776   :  { %1387 = vmatpush.bf16.msrb.mxu2 %v2002_v9 }
 0x7b2   :  { %v1142_v43 = vpop.xlane.xlu0 %1141 }
 0x7b3   :  { %v1144_v53 = vmul.f32 %v1142_v43, %v2357_v14 }
 0x7b5   :  { %v1146_v44 = vsub.f32 %v2920_v7, %v1144_v53 }
 0x7b7   :  { %v1148_v41 = vmul.f32 %v1146_v44, %v1146_v44 }
 0x7b9   :  { %v1152_v62 = vsel %vm95_vm0, %v1148_v41, 0.0 }
 0x7ba   :  { %1153 = vadd.xlane.f32.xlu2 %v1152_v62 }
 0x7d2   :  { %1747 = vrot.lane.b32.xlu2 %v1743_v46, %s2267_s16 }
 0x82d   :  { %v1154_v19 = vpop.xlane.xlu2 %1153 }
 0x82e   :  { %v1156_v20 = vmul.f32 %v1154_v19, %v2357_v14 }
 0x830   :  { %v1158_v50 = vadd.f32 1e-05, %v1156_v20  ;;  %v1999_v20 = vld [vmem:[%s3028_s8 + $0x10] sm:$0xff] }
 0x832   :  { %2137 = vrsqrt.f32 %v1158_v50  ;;  %vm1175_vm12 = vweird.f32 %v1158_v50 }
 0x838   :  { %v2138_v56 = vpop.eup %2137 }
 0x839   :  { %v1170_v28 = vmul.f32 %v2138_v56, %v1158_v50  ;;  %vm1176_vm11 = vweird.f32 %v2138_v56 }
 0x83a   :  { %vm1177_vm13 = vmor %vm1175_vm12, %vm1176_vm11 }
 0x83b   :  { %v1171_v42 = vmul.f32 %v2138_v56, %v1170_v28  ;;  %v1998_v28 = vld [vmem:[%s3028_s8 + $0x8] sm:$0xff] }
 0x83d   :  { %v1172_v13 = vmul.f32 0.5, %v1171_v42 }
 0x83f   :  { %v1173_v60 = vsub.f32 1.5, %v1172_v13  ;;  %v1997_v13 = vld [vmem:[%s3028_s8] sm:$0xff] }
 0x841   :  { %v1174_v2 = vmul.f32 %v2138_v56, %v1173_v60 }
 0x843   :  { %v1178_v14 = vsel %vm1177_vm13, %v2138_v56, %v1174_v2 }
 0x844   :  { %v1180_v48 = vmul.f32 %v1178_v14, %v1146_v44  ;;  %v2001_v44 = vld [vmem:[%s3028_s8 + $0x20] sm:$0xff] }
 0x845   :  { %1388 = vmatpush.bf16.msrb.mxu2 %v2001_v44 }
 0x846   :  { %v1185_v39 = vmul.f32 %v2146_v4, %v1180_v48 }
 0x848   :  { %v1190_v57 = vadd.f32 %v2147_v6, %v1185_v39 }
 0x849   :  { %1389 = vmatpush.bf16.msrb.mxu2 %v2000_v52 }
 0x84a   :  { %v1191_v8 = vpack.c.bf16 %v1190_v57, %v1189_v29 }
 0x84c   :  { %1885 = vmatmul.msk.bf16.vlgmr.msra.gmra.mxu1 %vm95_vm0, %v1191_v8 }
 0x84d   :  { %1390 = vmatpush.bf16.msrb.mxu2 %v1999_v20 }
 0x851   :  { %1391 = vmatpush.bf16.msrb.mxu2 %v1998_v28 }
 0x855   :  { %1392 = vmatpush.bf16.msrb.mxu2 %v1997_v13 }
 0x8c9   :  { %v1224_v10 = vpop.f32.mrf.mxu1 }
 0x8ca   :  { %v2949_v12 = vadd.f32 %v2071_v3, %v1224_v10 }
 0x8cc   :  { %v2952_v16 = vmul.f32 0.70710677, %v2949_v12 }
 0x8ce   :  { %v1233_v59 = vmul.f32 %v2952_v16, %v2952_v16 }
 0x8d0   :  { %v1234_v18 = vmin.f32 %v1233_v59, 16.0 }
 0x8d1   :  { %v1226_v58 = vpop.f32.mrf.mxu1 }
 0x8d2   :  { %v1235_v25 = vmul.f32 2.1237322e-06, %v1234_v18  ;;  %v1246_v15 = vmul.f32 3.8918573e-05, %v1234_v18  ;;  %v2959_v21 = vadd.f32 %v2071_v3, %v1226_v58 }
 0x8d4   :  { %v1236_v40 = vadd.f32 0.00028619796, %v1235_v25  ;;  %v1247_v27 = vadd.f32 0.001143296, %v1246_v15  ;;  %v2965_v31 = vmul.f32 0.70710677, %v2959_v21 }
 0x8d5   :  { %v1230_v52 = vmul.f32 0.5, %v2959_v21 }
 0x8d6   :  { %v1248_v33 = vmul.f32 %v1247_v27, %v1234_v18  ;;  %v1273_v23 = vmul.f32 %v2965_v31, %v2965_v31  ;;  %v1237_v34 = vmul.f32 %v1236_v40, %v1234_v18 }
 0x8d8   :  { %v1249_v11 = vadd.f32 0.014752088, %v1248_v33  ;;  %v1274_v43 = vmin.f32 %v1273_v23, 16.0  ;;  %v1238_v0 = vadd.f32 0.0036580483, %v1237_v34 }
 0x8da   :  { %v1250_v53 = vmul.f32 %v1249_v11, %v1234_v18  ;;  %v1275_v41 = vmul.f32 2.1237322e-06, %v1274_v43  ;;  %v1286_v62 = vmul.f32 3.8918573e-05, %v1274_v43  ;;  %v1239_v32 = vmul.f32 %v1238_v0, %v1234_v18 }
 0x8dc   :  { %v1251_v45 = vadd.f32 0.112945676, %v1250_v53  ;;  %v1276_v49 = vadd.f32 0.00028619796, %v1275_v41  ;;  %v1287_v46 = vadd.f32 0.001143296, %v1286_v62 }
 0x8dd   :  { %v1240_v24 = vadd.f32 0.05243302, %v1239_v32 }
 0x8de   :  { %v1252_v51 = vmul.f32 %v1251_v45, %v1234_v18  ;;  %v1277_v30 = vmul.f32 %v1276_v49, %v1274_v43  ;;  %v1288_v1 = vmul.f32 %v1287_v46, %v1274_v43 }
 0x8df   :  { %v1241_v61 = vmul.f32 %v1240_v24, %v1234_v18 }
 0x8e0   :  { %v1253_v37 = vadd.f32 0.4994258, %v1252_v51  ;;  %v1278_v35 = vadd.f32 0.0036580483, %v1277_v30  ;;  %v1289_v47 = vadd.f32 0.014752088, %v1288_v1 }
 0x8e1   :  { %v1242_v4 = vadd.f32 0.18741608, %v1241_v61  ;;  %v1229_v51 = vmul.f32 0.5, %v2949_v12  ;;  %v2149_v61 = vld [vmem:[%s3021_s1 + $0x10] sm:$0xff] }
 0x8e2   :  { %v1254_v19 = vmul.f32 %v1253_v37, %v1234_v18  ;;  %v1290_v50 = vmul.f32 %v1289_v47, %v1274_v43  ;;  %v1279_v56 = vmul.f32 %v1278_v35, %v1274_v43  ;;  %v1737_v35 = vpop.f32.mrf.mxu0  ;;  %v2072_v47 = vld [vmem:[#allocation5 + $0x5] ss:$0 sm:$0xff] }
 0x8e3   :  { %v1243_v29 = vmul.f32 %v1242_v4, %v1234_v18 }
 0x8e4   :  { %v1255_v54 = vadd.f32 1.0, %v1254_v19  ;;  %v1291_v26 = vadd.f32 0.112945676, %v1290_v50  ;;  %v1280_v60 = vadd.f32 0.05243302, %v1279_v56 }
 0x8e5   :  { %v1244_v22 = vadd.f32 1.1283791, %v1243_v29 }
 0x8e6   :  { %2139 = vrcp.f32 %v1255_v54  ;;  %v1292_v42 = vmul.f32 %v1291_v26, %v1274_v43  ;;  %v1281_v48 = vmul.f32 %v1280_v60, %v1274_v43  ;;  %v1267_v8 = vand.u32 2147483648, %v1255_v54  ;;  %v2148_v26 = vld [vmem:[%s3021_s1 + $0x18] sm:$0xff] }
 0x8e7   :  { %v1265_v10 = vand.u32 2147483647, %v1255_v54  ;;  %vm1261_vm5 = vweird.f32 %v1255_v54  ;;  %v1245_v33 = vmul.f32 %v1244_v22, %v2952_v16 }
 0x8e8   :  { %v1293_v55 = vadd.f32 0.4994258, %v1292_v42  ;;  %v1282_v3 = vadd.f32 0.18741608, %v1281_v48  ;;  %v1268_v15 = vor.u32 1.1754944e-38, %v1267_v8 }
 0x8e9   :  { %vm1266_vm15 = vcmp.eq.f32.partialorder %v1265_v10, 8.507059e+37 }
 0x8ea   :  { %v1294_v2 = vmul.f32 %v1293_v55, %v1274_v43  ;;  %v1283_v17 = vmul.f32 %v1282_v3, %v1274_v43  ;;  %v1739_v24 = vpop.f32.mrf.mxu0 }
 0x8eb   :  { %v1740_v12 = vadd.f32 %v2924_v36, %v1739_v24 }
 0x8ec   :  { %v2140_v14 = vpop.eup %2139  ;;  %v1295_v39 = vadd.f32 1.0, %v1294_v2  ;;  %v1284_v18 = vadd.f32 1.1283791, %v1283_v17 }
 0x8ed   :  { %v1257_v5 = vmul.f32 %v2140_v14, %v1255_v54  ;;  %vm1262_vm14 = vweird.f32 %v2140_v14  ;;  %v1745_v28 = vadd.f32 %v2148_v26, %v1740_v12 }
 0x8ee   :  { %2141 = vrcp.f32 %v1295_v39  ;;  %vm1263_vm6 = vmor %vm1261_vm5, %vm1262_vm14  ;;  %v1307_v23 = vand.u32 2147483648, %v1295_v39  ;;  %v1305_v53 = vand.u32 2147483647, %v1295_v39  ;;  %vm1301_vm2 = vweird.f32 %v1295_v39 }
 0x8ef   :  { %v1258_v6 = vsub.f32 1.0, %v1257_v5  ;;  %v1285_v0 = vmul.f32 %v1284_v18, %v2965_v31  ;;  %v2150_v5 = vld [vmem:[%s3021_s1] sm:$0xff] }
 0x8f0   :  { %v1308_v41 = vor.u32 1.1754944e-38, %v1307_v23  ;;  %vm1306_vm4 = vcmp.eq.f32.partialorder %v1305_v53, 8.507059e+37  ;;  %v1742_v48 = vadd.f32 %v2150_v5, %v2927_v38 }
 0x8f1   :  { %v1259_v57 = vmul.f32 %v2140_v14, %v1258_v6 }
 0x8f3   :  { %v1260_v59 = vadd.f32 %v2140_v14, %v1259_v57 }
 0x8f4   :  { %v2142_v58 = vpop.eup %2141 }
 0x8f5   :  { %v1264_v25 = vsel %vm1263_vm6, %v2140_v14, %v1260_v59  ;;  %v1297_v40 = vmul.f32 %v2142_v58, %v1295_v39  ;;  %vm1302_vm1 = vweird.f32 %v2142_v58 }
 0x8f6   :  { %v1269_v27 = vsel %vm1266_vm15, %v1268_v15, %v1264_v25  ;;  %vm1303_vm3 = vmor %vm1301_vm2, %vm1302_vm1 }
 0x8f7   :  { %v1298_v9 = vsub.f32 1.0, %v1297_v40  ;;  %v1270_v34 = vmul.f32 %v1269_v27, %v1245_v33 }
 0x8f9   :  { %v1299_v11 = vmul.f32 %v2142_v58, %v1298_v9  ;;  %v1886_v62 = vclamps-f32 %v1270_v34, 1.0 }
 0x8fb   :  { %v1300_v44 = vadd.f32 %v2142_v58, %v1299_v11  ;;  %v1313_v46 = vadd.f32 1.0, %v1886_v62 }
 0x8fd   :  { %v1304_v43 = vsel %vm1303_vm3, %v2142_v58, %v1300_v44  ;;  %v1315_v1 = vmul.f32 %v1313_v46, %v1229_v51 }
 0x8fe   :  { %v1309_v45 = vsel %vm1306_vm4, %v1308_v41, %v1304_v43 }
 0x8ff   :  { %v1310_v49 = vmul.f32 %v1309_v45, %v1285_v0 }
 0x901   :  { %v1887_v16 = vclamps-f32 %v1310_v49, 1.0 }
 0x903   :  { %v1314_v30 = vadd.f32 1.0, %v1887_v16 }
 0x905   :  { %v1316_v32 = vmul.f32 %v1314_v30, %v1230_v52 }
 0x907   :  { %v1317_v37 = vpack.c.bf16 %v1316_v32, %v1315_v1 }
 0x909   :  { %1393 = vmatmul.bf16.vlgmr.msrb.gmra.mxu2 %v1317_v37 }
 0x98c   :  { %v1394_v19 = vpop.f32.mrf.mxu2 }
 0x98d   :  { %v1395_v20 = vadd.f32 %v2072_v47, %v1394_v19 }
 0x98f   :  { %v1399_v31 = vadd.f32 %v1395_v20, %v2732_v63  ;;  %v1738_v63 = vadd.f32 %v2924_v36, %v1737_v35 }
 0x991   :  { %v1402_v50 = vrot.slane %v1399_v31, 4  ;;  %v1744_v13 = vadd.f32 %v2149_v61, %v1738_v63 }
 0x993   :  { %1403 = vrot.lane.b32.xlu1 %v1402_v50, %s2267_s16 }
 0x994   :  { %v1396_v54 = vpop.f32.mrf.mxu2 }
 0x995   :  { %v1397_v56 = vadd.f32 %v2072_v47, %v1396_v54 }
 0x997   :  { %v1400_v21 = vadd.f32 %v1397_v56, %v2920_v7  ;;  %v1748_v7 = vpop.permute.xlu2 %1747 }
 0x998   :  { %v1758_v39 = vsel %vm95_vm0, %v1742_v48, %v1748_v7 }
 0x999   :  { %1407 = vrot.lane.b32.xlu0 %v1400_v21, %s2256_s25  ;;  %v1410_v42 = vrot.slane %v1400_v21, 4 }
 0x99b   :  { %1411 = vrot.lane.b32.xlu2 %v1410_v42, %s2268_s0  ;;  %1755 = vrot.lane.b32.xlu1 %v1745_v28, %s2268_s0 }
 0x9a1   :  { %1751 = vrot.lane.b32.xlu0 %v1744_v13, %s2256_s25 }
 0x9f5   :  { %v1412_v2 = vpop.permute.xlu2 %1411 }
 0xa05   :  { %v1404_v60 = vpop.permute.xlu1 %1403 }
 0xa06   :  { %v1414_v36 = vsel %vm95_vm0, %v1399_v31, %v1404_v60 }
 0xa0b   :  { %v1408_v55 = vpop.permute.xlu0 %1407 }
 0xa0c   :  { %v1416_v14 = vsel %vm1415_vm7, %v1414_v36, %v1408_v55 }
 0xa0d   :  { %v1418_v4 = vsel %vm1417_vm8, %v1416_v14, %v1412_v2  ;;  %v1756_v29 = vpop.permute.xlu1 %1755 }
 0xa0e   :  { %1419 = vst [vmem:[#allocation7] sm:$0xf] %v1418_v4 }
 0xa0f   :  { %1772 = dma.vmem_to_hbm [thread:$0]  %s1768_s18, 64, %s1770_s6, [#allocation4]  }
 0xa13   :  { %v1752_v6 = vpop.permute.xlu0 %1751 }
 0xa14   :  { %v1759_v57 = vsel %vm1415_vm7, %v1758_v39, %v1752_v6 }
 0xa15   :  { %v1760_v8 = vsel %vm1417_vm8, %v1759_v57, %v1756_v29 }
 0xa16   :  { %1761 = vst [vmem:[#allocation8] sm:$0xff] %v1760_v8 }
 0xa17   :  { %1783 = dma.vmem_to_hbm [thread:$0]  %s1779_s21, 128, %s1781_s23, [#allocation9]  }
 0xa18   :  { %2251 = dma.done.wait [#allocation4], 64  }
 0xa19   :  { %2252 = vsyncadd [#allocation4], 4294967232 }
 0xa1a   :  { %2253 = dma.done.wait [#allocation9], 128  }
 0xa1b   :  { %2254 = vsyncadd [#allocation9], 4294967168 }
 0xa1c   :  { %1792 = vsyncpa [#allocation3], 1 }
 0xa1d   :  { %1793 = vsyncpa [#allocation6], 1 }
 0xa1e   :  { %1794 = vsyncpa [#allocation4], 1 }
 0xa1f   :  { %1795 = vsyncpa [#allocation9], 1 }

</bundles_post_ra>
